<compile_context>
chip_gen: v7x
topology: tpu7x:2x2x1
jax: 0.10.0
libtpu: 0.0.40
codegen_flags: <defaults>
</compile_context>

<pallas_src>
import functools
import math

import jax
import jax.numpy as jnp
from jax.experimental import pallas as pl
from jax.experimental.pallas import tpu as pltpu

NEG_SLOPE = 0.01   # nn.LeakyReLU default
LN_EPS = 1e-5      # nn.LayerNorm default
MASK_NEG = -1e30


def _leaky_relu(x):
    return jnp.where(x > 0, x, NEG_SLOPE * x)


def _layer_norm(x, g, b):
    # One-pass statistics: var = E[x^2] - mu^2 (both reductions independent).
    mu = jnp.mean(x, axis=-1, keepdims=True)
    ms = jnp.mean(x * x, axis=-1, keepdims=True)
    var = ms - mu * mu
    return (x - mu) * jax.lax.rsqrt(var + LN_EPS) * g + b


def _softmax_kernel(x):
    # In-kernel softmax: divide goes to the EUP slot (approx reciprocal).
    m = jnp.max(x, axis=-1, keepdims=True)
    e = jnp.exp(x - m)
    return e * pl.reciprocal(jnp.sum(e, axis=-1, keepdims=True), approx=True)


def _softmax_ref(x):
    m = jnp.max(x, axis=-1, keepdims=True)
    e = jnp.exp(x - m)
    return e / jnp.sum(e, axis=-1, keepdims=True)


def transformer_discriminator_kernel(
    x_ref,
    enc_w0_ref, enc_b0_ref, enc_w1_ref, enc_b1_ref,
    wqkv_ref, bqkv_ref, wo_ref, bo_ref,
    ln1g_ref, ln1b_ref, w1_ref, b1_ref, w2_ref, b2_ref, ln2g_ref, ln2b_ref,
    head_w_ref, head_b_ref,
    out_ref,
    *, block_seqs, group_seqs, seq_len, num_layers, out_dim,
):
    hidden = enc_w1_ref.shape[1]
    block_rows = block_seqs * seq_len
    group_rows = group_seqs * seq_len
    n_groups = block_seqs // group_seqs
    bf16 = jnp.bfloat16

    # --- "conv" encoder (really an MLP): Linear + LeakyReLU, twice -----------
    x = x_ref[...].astype(bf16)                                   # (B_blk, C_in)
    h = _leaky_relu(
        jnp.dot(x, enc_w0_ref[...], preferred_element_type=jnp.float32)
        + enc_b0_ref[...])
    h = _leaky_relu(
        jnp.dot(h.astype(bf16), enc_w1_ref[...],
                preferred_element_type=jnp.float32)
        + enc_b1_ref[...])                                        # (B_blk, H) f32

    # Static block-diagonal attention mask (hoisted out of the layer loop):
    # entries are 0 within a sequence's TxT diagonal block, -1e30 elsewhere.
    if group_seqs > 1:
        r = jax.lax.broadcasted_iota(jnp.int32, (group_rows, group_rows), 0)
        c = jax.lax.broadcasted_iota(jnp.int32, (group_rows, group_rows), 1)
        mask_bias = jnp.where((r // seq_len) == (c // seq_len),
                              0.0, MASK_NEG).astype(jnp.float32)
    else:
        mask_bias = None   # one sequence per group -> no masking needed

    # --- transformer encoder layers (batched over all sequences in block) ----
    for l in range(num_layers):
        # fused Q/K/V projection: one matmul, then lane slices.
        # 1/sqrt(d) is already folded into the Q columns of wqkv (wrapper).
        qkv = jnp.dot(h.astype(bf16), wqkv_ref[l],
                      preferred_element_type=jnp.float32) + bqkv_ref[l]
        q = qkv[:, :hidden]
        k = qkv[:, hidden:2 * hidden]
        v = qkv[:, 2 * hidden:]

        qg = q.reshape(n_groups, group_rows, hidden).astype(bf16)
        kg = k.reshape(n_groups, group_rows, hidden).astype(bf16)
        vg = v.reshape(n_groups, group_rows, hidden).astype(bf16)

        # grouped scores: (G_rows, H) @ (H, G_rows) per group, lane-dense.
        scores = jnp.einsum("gtd,gsd->gts", qg, kg,
                            preferred_element_type=jnp.float32)
        if mask_bias is not None:
            scores = scores + mask_bias                           # block-diag mask
        p = _softmax_kernel(scores)                               # (G, GR, GR) f32
        ag = jnp.einsum("gts,gsd->gtd", p.astype(bf16), vg,
                        preferred_element_type=jnp.float32)       # (G, GR, H)
        a = ag.reshape(block_rows, hidden)
        a = jnp.dot(a.astype(bf16), wo_ref[l],
                    preferred_element_type=jnp.float32) + bo_ref[l]

        # residual + post-LayerNorm (norm_first=False default)
        h = _layer_norm(h + a, ln1g_ref[l], ln1b_ref[l])

        # feed-forward (ReLU activation, dim_feedforward = H)
        f = jnp.maximum(
            jnp.dot(h.astype(bf16), w1_ref[l],
                    preferred_element_type=jnp.float32) + b1_ref[l],
            0.0)
        f = jnp.dot(f.astype(bf16), w2_ref[l],
                    preferred_element_type=jnp.float32) + b2_ref[l]
        h = _layer_norm(h + f, ln2g_ref[l], ln2b_ref[l])

    # --- head + sum over time, fused:  sum_t(h_t @ W + b) = (sum_t h_t)@W + T*b
    h3 = h.reshape(block_seqs, seq_len, hidden)
    hsum = jnp.sum(h3, axis=1)                                    # (S, H)
    o = jnp.dot(hsum.astype(bf16), head_w_ref[...],
                preferred_element_type=jnp.float32) \
        + float(seq_len) * head_b_ref[...]                        # (S, out_dim)

    # lane-dense store: one (1, 1, S*out_dim) row per grid step
    out_ref[...] = o.reshape(1, 1, block_seqs * out_dim)


def transformer_discriminator(x, seq_lens, params, *, num_layers, out_dim,
                              block_seqs=None, group_target_rows=256,
                              max_block_rows=8192):
    b_total, in_ch = x.shape
    num_seqs = int(seq_lens.shape[0])
    assert b_total % num_seqs == 0, (
        "batch rows must be divisible by number of sequences "
        f"(got {b_total} rows, {num_seqs} sequences)")
    seq_len = b_total // num_seqs   # max_seq_len = encoded_obs.shape[0] // seq_lens.shape[0]
    hidden = params["enc_w1"].shape[1]

    # --- pick sequences-per-block: large row blocks (amortize pipeline
    # overhead, enlarge matmul M) but prefer >=2 grid blocks so both v7x
    # TensorCores are used via the parallel grid axis.
    if block_seqs is None:
        cands = [d for d in range(1, num_seqs + 1)
                 if num_seqs % d == 0
                 and (d * seq_len) % 8 == 0
                 and d * seq_len <= max_block_rows]
        multi = [d for d in cands if num_seqs // d >= 2]
        if multi:
            block_seqs = max(multi)
        elif cands:
            block_seqs = max(cands)
        else:
            block_seqs = num_seqs
    assert num_seqs % block_seqs == 0
    num_blocks = num_seqs // block_seqs
    block_rows = block_seqs * seq_len

    # --- pick sequences-per-attention-group so group_rows ~ group_target_rows
    # (256 rows matches the v6e/v7x 256-wide MXU; also fine on v5e).
    g_cands = [g for g in range(1, block_seqs + 1)
               if block_seqs % g == 0 and g * seq_len <= group_target_rows]
    g_aligned = [g for g in g_cands if (g * seq_len) % 8 == 0]
    if g_aligned:
        group_seqs = max(g_aligned)
    elif g_cands:
        group_seqs = max(g_cands)
    else:
        group_seqs = 1

    # --- fuse Q/K/V weights -> one (L, H, 3H) weight / (L, 1, 3H) bias, with
    # the 1/sqrt(d) attention scale folded into the Q columns.  MXU-operand
    # weights are pre-cast to bf16; biases / LayerNorm params stay f32.
    inv_sqrt_d = 1.0 / math.sqrt(hidden)
    wqkv = jnp.concatenate(
        [params["wq"] * inv_sqrt_d, params["wk"], params["wv"]],
        axis=-1).astype(jnp.bfloat16)
    bqkv = jnp.concatenate(
        [params["bq"] * inv_sqrt_d, params["bk"], params["bv"]],
        axis=-1).astype(jnp.float32)

    weights = (
        params["enc_w0"].astype(jnp.bfloat16), params["enc_b0"],
        params["enc_w1"].astype(jnp.bfloat16), params["enc_b1"],
        wqkv, bqkv,
        params["wo"].astype(jnp.bfloat16), params["bo"],
        params["ln1g"], params["ln1b"],
        params["w1"].astype(jnp.bfloat16), params["b1"],
        params["w2"].astype(jnp.bfloat16), params["b2"],
        params["ln2g"], params["ln2b"],
        params["head_w"].astype(jnp.bfloat16), params["head_b"],
    )

    def _rep(arr):
        nd = arr.ndim
        return pl.BlockSpec(arr.shape, lambda i, _nd=nd: (0,) * _nd)

    kernel = functools.partial(
        transformer_discriminator_kernel,
        block_seqs=block_seqs, group_seqs=group_seqs, seq_len=seq_len,
        num_layers=num_layers, out_dim=out_dim)

    out = pl.pallas_call(
        kernel,
        out_shape=jax.ShapeDtypeStruct(
            (num_blocks, 1, block_seqs * out_dim), jnp.float32),
        grid=(num_blocks,),
        in_specs=[pl.BlockSpec((block_rows, in_ch), lambda i: (i, 0))]
                 + [_rep(w) for w in weights],
        out_specs=pl.BlockSpec((1, 1, block_seqs * out_dim),
                               lambda i: (i, 0, 0)),
        compiler_params=pltpu.CompilerParams(
            dimension_semantics=("parallel",),
            vmem_limit_bytes=56 * 1024 * 1024),
    )(x, *weights)

    return out.reshape(num_seqs, out_dim)


def reference(x, params, num_seqs, seq_len, num_layers):
    """Pure-JAX f32 reference (same math, 3-D form) for validation."""
    h = _leaky_relu(x @ params["enc_w0"] + params["enc_b0"])
    h = _leaky_relu(h @ params["enc_w1"] + params["enc_b1"])
    hidden = h.shape[-1]
    h = h.reshape(num_seqs, seq_len, hidden)
    inv_sqrt_d = 1.0 / math.sqrt(hidden)
    for l in range(num_layers):
        q = h @ params["wq"][l] + params["bq"][l]
        k = h @ params["wk"][l] + params["bk"][l]
        v = h @ params["wv"][l] + params["bv"][l]
        scores = jnp.einsum("btd,bsd->bts", q, k) * inv_sqrt_d
        p = _softmax_ref(scores)
        a = jnp.einsum("bts,bsd->btd", p, v)
        a = a @ params["wo"][l] + params["bo"][l]
        h = _layer_norm(h + a, params["ln1g"][l], params["ln1b"][l])
        f = jnp.maximum(h @ params["w1"][l] + params["b1"][l], 0.0)
        f = f @ params["w2"][l] + params["b2"][l]
        h = _layer_norm(h + f, params["ln2g"][l], params["ln2b"][l])
    o = h @ params["head_w"] + params["head_b"]
    return jnp.sum(o, axis=1)


if __name__ == "__main__":
    IN_CH = 24                            # obs features + num_outputs
    HIDDEN = 32                           # size_hidden_layers, scale=1
    NUM_LAYERS = 2                        # num_hidden_layers -> transformer depth
    OUT_DIM = 1

    keys = jax.random.split(jax.random.PRNGKey(0), 24)

    def w(k, shape, scale=0.1):
        return jax.random.normal(k, shape, jnp.float32) * scale

    params = {
        # encoder (num_conv_layers=1 -> two Linear layers), weights stored (in, out)
        "enc_w0": w(keys[0], (IN_CH, HIDDEN)),
        "enc_b0": w(keys[1], (1, HIDDEN)),
        "enc_w1": w(keys[2], (HIDDEN, HIDDEN)),
        "enc_b1": w(keys[3], (1, HIDDEN)),
        # per-layer transformer params, stacked on leading layer axis
        "wq": w(keys[4], (NUM_LAYERS, HIDDEN, HIDDEN)),
        "bq": w(keys[5], (NUM_LAYERS, 1, HIDDEN)),
        "wk": w(keys[6], (NUM_LAYERS, HIDDEN, HIDDEN)),
        "bk": w(keys[7], (NUM_LAYERS, 1, HIDDEN)),
        "wv": w(keys[8], (NUM_LAYERS, HIDDEN, HIDDEN)),
        "bv": w(keys[9], (NUM_LAYERS, 1, HIDDEN)),
        "wo": w(keys[10], (NUM_LAYERS, HIDDEN, HIDDEN)),
        "bo": w(keys[11], (NUM_LAYERS, 1, HIDDEN)),
        "ln1g": jnp.ones((NUM_LAYERS, 1, HIDDEN), jnp.float32),
        "ln1b": jnp.zeros((NUM_LAYERS, 1, HIDDEN), jnp.float32),
        "w1": w(keys[12], (NUM_LAYERS, HIDDEN, HIDDEN)),
        "b1": w(keys[13], (NUM_LAYERS, 1, HIDDEN)),
        "w2": w(keys[14], (NUM_LAYERS, HIDDEN, HIDDEN)),
        "b2": w(keys[15], (NUM_LAYERS, 1, HIDDEN)),
        "ln2g": jnp.ones((NUM_LAYERS, 1, HIDDEN), jnp.float32),
        "ln2b": jnp.zeros((NUM_LAYERS, 1, HIDDEN), jnp.float32),
        # head
        "head_w": w(keys[16], (HIDDEN, OUT_DIM)),
        "head_b": w(keys[17], (1, OUT_DIM)),
    }

    # bf16 MXU operands -> validate against the f32 reference with a loosened
    # tolerance (the approx softmax reciprocal adds a little more).
    ATOL = RTOL = 5e-2

    # --- test 1: tiny RLlib batch (2 sequences of length 8) ------------------
    NUM_SEQS, SEQ_LEN = 2, 8
    x = jax.random.normal(keys[20], (NUM_SEQS * SEQ_LEN, IN_CH), jnp.float32)
    seq_lens = jnp.full((NUM_SEQS,), SEQ_LEN, jnp.int32)
    out = transformer_discriminator(
        x, seq_lens, params, num_layers=NUM_LAYERS, out_dim=OUT_DIM)
    out = jax.block_until_ready(out)
    ref = reference(x, params, NUM_SEQS, SEQ_LEN, NUM_LAYERS)
    assert out.shape == (NUM_SEQS, OUT_DIM), out.shape
    assert jnp.allclose(out, ref, atol=ATOL, rtol=RTOL), (out, ref)

    # --- test 2: 8 sequences -> exercises grouped block-diagonal attention ----
    NUM_SEQS2, SEQ_LEN2 = 8, 8
    x2 = jax.random.normal(keys[21], (NUM_SEQS2 * SEQ_LEN2, IN_CH), jnp.float32)
    seq_lens2 = jnp.full((NUM_SEQS2,), SEQ_LEN2, jnp.int32)
    out2 = jax.block_until_ready(transformer_discriminator(
        x2, seq_lens2, params, num_layers=NUM_LAYERS, out_dim=OUT_DIM))
    ref2 = reference(x2, params, NUM_SEQS2, SEQ_LEN2, NUM_LAYERS)
    assert out2.shape == (NUM_SEQS2, OUT_DIM), out2.shape
    assert jnp.allclose(out2, ref2, atol=ATOL, rtol=RTOL), (out2, ref2)

    print("KERNEL_OK")
</pallas_src>

<mosaic_0001>
module attributes {stable_mosaic.version = 11 : i64} {
  func.func @transformer_discriminator_kernel(%arg0: i32, %arg1: memref<8x24xf32, #tpu.memory_space<vmem>>, %arg2: memref<24x32xbf16, #tpu.memory_space<vmem>>, %arg3: memref<1x32xf32, #tpu.memory_space<vmem>>, %arg4: memref<32x32xbf16, #tpu.memory_space<vmem>>, %arg5: memref<1x32xf32, #tpu.memory_space<vmem>>, %arg6: memref<2x32x96xbf16, #tpu.memory_space<vmem>>, %arg7: memref<2x1x96xf32, #tpu.memory_space<vmem>>, %arg8: memref<2x32x32xbf16, #tpu.memory_space<vmem>>, %arg9: memref<2x1x32xf32, #tpu.memory_space<vmem>>, %arg10: memref<2x1x32xf32, #tpu.memory_space<vmem>>, %arg11: memref<2x1x32xf32, #tpu.memory_space<vmem>>, %arg12: memref<2x32x32xbf16, #tpu.memory_space<vmem>>, %arg13: memref<2x1x32xf32, #tpu.memory_space<vmem>>, %arg14: memref<2x32x32xbf16, #tpu.memory_space<vmem>>, %arg15: memref<2x1x32xf32, #tpu.memory_space<vmem>>, %arg16: memref<2x1x32xf32, #tpu.memory_space<vmem>>, %arg17: memref<2x1x32xf32, #tpu.memory_space<vmem>>, %arg18: memref<32x1xbf16, #tpu.memory_space<vmem>>, %arg19: memref<1x1xf32, #tpu.memory_space<vmem>>, %arg20: memref<1x1x1xf32, #tpu.memory_space<vmem>>) attributes {dimension_semantics = [#tpu.dimension_semantics<parallel>], iteration_bounds = array<i64: 2>, scalar_prefetch = 0 : i64, scratch_operands = 0 : i64, tpu.core_type = #tpu.core_type<tc>, window_params = [{transform_indices = @transform_0, window_bounds = array<i64: 8, 24>}, {pipeline_mode = #tpu.pipeline_mode<synchronous>, transform_indices = @transform_1, window_bounds = array<i64: 24, 32>}, {pipeline_mode = #tpu.pipeline_mode<synchronous>, transform_indices = @transform_2, window_bounds = array<i64: 1, 32>}, {pipeline_mode = #tpu.pipeline_mode<synchronous>, transform_indices = @transform_3, window_bounds = array<i64: 32, 32>}, {pipeline_mode = #tpu.pipeline_mode<synchronous>, transform_indices = @transform_4, window_bounds = array<i64: 1, 32>}, {pipeline_mode = #tpu.pipeline_mode<synchronous>, transform_indices = @transform_5, window_bounds = array<i64: 2, 32, 96>}, {pipeline_mode = #tpu.pipeline_mode<synchronous>, transform_indices = @transform_6, window_bounds = array<i64: 2, 1, 96>}, {pipeline_mode = #tpu.pipeline_mode<synchronous>, transform_indices = @transform_7, window_bounds = array<i64: 2, 32, 32>}, {pipeline_mode = #tpu.pipeline_mode<synchronous>, transform_indices = @transform_8, window_bounds = array<i64: 2, 1, 32>}, {pipeline_mode = #tpu.pipeline_mode<synchronous>, transform_indices = @transform_9, window_bounds = array<i64: 2, 1, 32>}, {pipeline_mode = #tpu.pipeline_mode<synchronous>, transform_indices = @transform_10, window_bounds = array<i64: 2, 1, 32>}, {pipeline_mode = #tpu.pipeline_mode<synchronous>, transform_indices = @transform_11, window_bounds = array<i64: 2, 32, 32>}, {pipeline_mode = #tpu.pipeline_mode<synchronous>, transform_indices = @transform_12, window_bounds = array<i64: 2, 1, 32>}, {pipeline_mode = #tpu.pipeline_mode<synchronous>, transform_indices = @transform_13, window_bounds = array<i64: 2, 32, 32>}, {pipeline_mode = #tpu.pipeline_mode<synchronous>, transform_indices = @transform_14, window_bounds = array<i64: 2, 1, 32>}, {pipeline_mode = #tpu.pipeline_mode<synchronous>, transform_indices = @transform_15, window_bounds = array<i64: 2, 1, 32>}, {pipeline_mode = #tpu.pipeline_mode<synchronous>, transform_indices = @transform_16, window_bounds = array<i64: 2, 1, 32>}, {pipeline_mode = #tpu.pipeline_mode<synchronous>, transform_indices = @transform_17, window_bounds = array<i64: 32, 1>}, {pipeline_mode = #tpu.pipeline_mode<synchronous>, transform_indices = @transform_18, window_bounds = array<i64: 1, 1>}, {transform_indices = @transform_19, window_bounds = array<i64: 1, 1, 1>}]} {
    %c0 = arith.constant 0 : index
    %c0_0 = arith.constant 0 : index
    %0 = vector.load %arg1[%c0, %c0_0] : memref<8x24xf32, #tpu.memory_space<vmem>>, vector<8x24xf32>
    %1 = arith.truncf %0 : vector<8x24xf32> to vector<8x24xbf16>
    %c0_1 = arith.constant 0 : index
    %c0_2 = arith.constant 0 : index
    %2 = vector.load %arg2[%c0_1, %c0_2] : memref<24x32xbf16, #tpu.memory_space<vmem>>, vector<24x32xbf16>
    %cst = arith.constant dense<0.000000e+00> : vector<8x32xf32>
    %3 = tpu.matmul %1, %2, %cst {dimension_numbers = #tpu.dot_dimension_numbers<[1], [0], [0], [1], [0, 0, 1, 1], [], []>} : vector<8x24xbf16>, vector<24x32xbf16>, vector<8x32xf32> -> vector<8x32xf32>
    %c0_3 = arith.constant 0 : index
    %c0_4 = arith.constant 0 : index
    %4 = vector.load %arg3[%c0_3, %c0_4] : memref<1x32xf32, #tpu.memory_space<vmem>>, vector<1x32xf32>
    %5 = vector.broadcast %4 : vector<1x32xf32> to vector<8x32xf32>
    %6 = arith.addf %3, %5 : vector<8x32xf32>
    %cst_5 = arith.constant 0.000000e+00 : f32
    %7 = vector.broadcast %cst_5 : f32 to vector<8x32xf32>
    %8 = arith.cmpf ogt, %6, %7 : vector<8x32xf32>
    %cst_6 = arith.constant 0.00999999977 : f32
    %9 = vector.broadcast %cst_6 : f32 to vector<8x32xf32>
    %10 = arith.mulf %9, %6 : vector<8x32xf32>
    %11 = arith.select %8, %6, %10 : vector<8x32xi1>, vector<8x32xf32>
    %12 = arith.truncf %11 : vector<8x32xf32> to vector<8x32xbf16>
    %c0_7 = arith.constant 0 : index
    %c0_8 = arith.constant 0 : index
    %13 = vector.load %arg4[%c0_7, %c0_8] : memref<32x32xbf16, #tpu.memory_space<vmem>>, vector<32x32xbf16>
    %cst_9 = arith.constant dense<0.000000e+00> : vector<8x32xf32>
    %14 = tpu.matmul %12, %13, %cst_9 {dimension_numbers = #tpu.dot_dimension_numbers<[1], [0], [0], [1], [0, 0, 1, 1], [], []>} : vector<8x32xbf16>, vector<32x32xbf16>, vector<8x32xf32> -> vector<8x32xf32>
    %c0_10 = arith.constant 0 : index
    %c0_11 = arith.constant 0 : index
    %15 = vector.load %arg5[%c0_10, %c0_11] : memref<1x32xf32, #tpu.memory_space<vmem>>, vector<1x32xf32>
    %16 = vector.broadcast %15 : vector<1x32xf32> to vector<8x32xf32>
    %17 = arith.addf %14, %16 : vector<8x32xf32>
    %cst_12 = arith.constant 0.000000e+00 : f32
    %18 = vector.broadcast %cst_12 : f32 to vector<8x32xf32>
    %19 = arith.cmpf ogt, %17, %18 : vector<8x32xf32>
    %cst_13 = arith.constant 0.00999999977 : f32
    %20 = vector.broadcast %cst_13 : f32 to vector<8x32xf32>
    %21 = arith.mulf %20, %17 : vector<8x32xf32>
    %22 = arith.select %19, %17, %21 : vector<8x32xi1>, vector<8x32xf32>
    %23 = arith.truncf %22 : vector<8x32xf32> to vector<8x32xbf16>
    %c0_14 = arith.constant 0 : index
    %c0_15 = arith.constant 0 : index
    %c0_16 = arith.constant 0 : index
    %24 = vector.load %arg6[%c0_14, %c0_15, %c0_16] : memref<2x32x96xbf16, #tpu.memory_space<vmem>>, vector<1x32x96xbf16>
    %25 = vector.shape_cast %24 : vector<1x32x96xbf16> to vector<32x96xbf16>
    %cst_17 = arith.constant dense<0.000000e+00> : vector<8x96xf32>
    %26 = tpu.matmul %23, %25, %cst_17 {dimension_numbers = #tpu.dot_dimension_numbers<[1], [0], [0], [1], [0, 0, 1, 1], [], []>} : vector<8x32xbf16>, vector<32x96xbf16>, vector<8x96xf32> -> vector<8x96xf32>
    %c0_18 = arith.constant 0 : index
    %c0_19 = arith.constant 0 : index
    %c0_20 = arith.constant 0 : index
    %27 = vector.load %arg7[%c0_18, %c0_19, %c0_20] : memref<2x1x96xf32, #tpu.memory_space<vmem>>, vector<1x1x96xf32>
    %28 = vector.shape_cast %27 : vector<1x1x96xf32> to vector<1x96xf32>
    %29 = vector.broadcast %28 : vector<1x96xf32> to vector<8x96xf32>
    %30 = arith.addf %26, %29 : vector<8x96xf32>
    %31 = vector.extract_strided_slice %30 {offsets = [0, 0], sizes = [8, 32], strides = [1, 1]} : vector<8x96xf32> to vector<8x32xf32>
    %32 = vector.extract_strided_slice %30 {offsets = [0, 32], sizes = [8, 32], strides = [1, 1]} : vector<8x96xf32> to vector<8x32xf32>
    %33 = vector.extract_strided_slice %30 {offsets = [0, 64], sizes = [8, 32], strides = [1, 1]} : vector<8x96xf32> to vector<8x32xf32>
    %34 = vector.shape_cast %31 : vector<8x32xf32> to vector<1x8x32xf32>
    %35 = arith.truncf %34 : vector<1x8x32xf32> to vector<1x8x32xbf16>
    %36 = vector.shape_cast %32 : vector<8x32xf32> to vector<1x8x32xf32>
    %37 = arith.truncf %36 : vector<1x8x32xf32> to vector<1x8x32xbf16>
    %38 = vector.shape_cast %33 : vector<8x32xf32> to vector<1x8x32xf32>
    %39 = arith.truncf %38 : vector<1x8x32xf32> to vector<1x8x32xbf16>
    "tpu.trace_start"() <{level = 10 : i32, message = "gtd,gsd->gts"}> : () -> ()
    %cst_21 = arith.constant dense<0.000000e+00> : vector<1x8x8xf32>
    %40 = tpu.matmul %35, %37, %cst_21 {dimension_numbers = #tpu.dot_dimension_numbers<[2], [2], [1], [1], [0, 0, 0, 1, 1, 1], [0], [0]>} : vector<1x8x32xbf16>, vector<1x8x32xbf16>, vector<1x8x8xf32> -> vector<1x8x8xf32>
    "tpu.trace_stop"() : () -> ()
    %cst_22 = arith.constant dense<0xFF800000> : vector<1x8xf32>
    %41 = vector.multi_reduction <maximumf>, %40, %cst_22 [2] : vector<1x8x8xf32> to vector<1x8xf32>
    %42 = vector.shape_cast %41 : vector<1x8xf32> to vector<1x8x1xf32>
    %43 = vector.broadcast %42 : vector<1x8x1xf32> to vector<1x8x8xf32>
    %44 = arith.subf %40, %43 : vector<1x8x8xf32>
    %45 = math.exp %44 : vector<1x8x8xf32>
    %cst_23 = arith.constant dense<0.000000e+00> : vector<1x8xf32>
    %46 = vector.multi_reduction <add>, %45, %cst_23 [2] : vector<1x8x8xf32> to vector<1x8xf32>
    %47 = vector.shape_cast %46 : vector<1x8xf32> to vector<1x8x1xf32>
    %48 = tpu.reciprocal %47 {approx = true} : vector<1x8x1xf32> -> vector<1x8x1xf32>
    %49 = vector.broadcast %48 : vector<1x8x1xf32> to vector<1x8x8xf32>
    %50 = arith.mulf %45, %49 : vector<1x8x8xf32>
    %51 = arith.truncf %50 : vector<1x8x8xf32> to vector<1x8x8xbf16>
    "tpu.trace_start"() <{level = 10 : i32, message = "gts,gsd->gtd"}> : () -> ()
    %cst_24 = arith.constant dense<0.000000e+00> : vector<1x8x32xf32>
    %52 = tpu.matmul %51, %39, %cst_24 {dimension_numbers = #tpu.dot_dimension_numbers<[2], [1], [1], [2], [0, 0, 0, 1, 1, 2], [0], [0]>} : vector<1x8x8xbf16>, vector<1x8x32xbf16>, vector<1x8x32xf32> -> vector<1x8x32xf32>
    "tpu.trace_stop"() : () -> ()
    %53 = vector.shape_cast %52 : vector<1x8x32xf32> to vector<8x32xf32>
    %54 = arith.truncf %53 : vector<8x32xf32> to vector<8x32xbf16>
    %c0_25 = arith.constant 0 : index
    %c0_26 = arith.constant 0 : index
    %c0_27 = arith.constant 0 : index
    %55 = vector.load %arg8[%c0_25, %c0_26, %c0_27] : memref<2x32x32xbf16, #tpu.memory_space<vmem>>, vector<1x32x32xbf16>
    %56 = vector.shape_cast %55 : vector<1x32x32xbf16> to vector<32x32xbf16>
    %cst_28 = arith.constant dense<0.000000e+00> : vector<8x32xf32>
    %57 = tpu.matmul %54, %56, %cst_28 {dimension_numbers = #tpu.dot_dimension_numbers<[1], [0], [0], [1], [0, 0, 1, 1], [], []>} : vector<8x32xbf16>, vector<32x32xbf16>, vector<8x32xf32> -> vector<8x32xf32>
    %c0_29 = arith.constant 0 : index
    %c0_30 = arith.constant 0 : index
    %c0_31 = arith.constant 0 : index
    %58 = vector.load %arg9[%c0_29, %c0_30, %c0_31] : memref<2x1x32xf32, #tpu.memory_space<vmem>>, vector<1x1x32xf32>
    %59 = vector.shape_cast %58 : vector<1x1x32xf32> to vector<1x32xf32>
    %60 = vector.broadcast %59 : vector<1x32xf32> to vector<8x32xf32>
    %61 = arith.addf %57, %60 : vector<8x32xf32>
    %62 = arith.addf %22, %61 : vector<8x32xf32>
    %c0_32 = arith.constant 0 : index
    %c0_33 = arith.constant 0 : index
    %c0_34 = arith.constant 0 : index
    %63 = vector.load %arg10[%c0_32, %c0_33, %c0_34] : memref<2x1x32xf32, #tpu.memory_space<vmem>>, vector<1x1x32xf32>
    %64 = vector.shape_cast %63 : vector<1x1x32xf32> to vector<1x32xf32>
    %c0_35 = arith.constant 0 : index
    %c0_36 = arith.constant 0 : index
    %c0_37 = arith.constant 0 : index
    %65 = vector.load %arg11[%c0_35, %c0_36, %c0_37] : memref<2x1x32xf32, #tpu.memory_space<vmem>>, vector<1x1x32xf32>
    %66 = vector.shape_cast %65 : vector<1x1x32xf32> to vector<1x32xf32>
    %cst_38 = arith.constant dense<0.000000e+00> : vector<8xf32>
    %67 = vector.multi_reduction <add>, %62, %cst_38 [1] : vector<8x32xf32> to vector<8xf32>
    %68 = vector.shape_cast %67 : vector<8xf32> to vector<8x1xf32>
    %cst_39 = arith.constant 3.200000e+01 : f32
    %69 = vector.broadcast %cst_39 : f32 to vector<8x1xf32>
    %70 = arith.divf %68, %69 : vector<8x1xf32>
    %71 = arith.mulf %62, %62 : vector<8x32xf32>
    %cst_40 = arith.constant dense<0.000000e+00> : vector<8xf32>
    %72 = vector.multi_reduction <add>, %71, %cst_40 [1] : vector<8x32xf32> to vector<8xf32>
    %73 = vector.shape_cast %72 : vector<8xf32> to vector<8x1xf32>
    %cst_41 = arith.constant 3.200000e+01 : f32
    %74 = vector.broadcast %cst_41 : f32 to vector<8x1xf32>
    %75 = arith.divf %73, %74 : vector<8x1xf32>
    %76 = arith.mulf %70, %70 : vector<8x1xf32>
    %77 = arith.subf %75, %76 : vector<8x1xf32>
    %78 = vector.broadcast %70 : vector<8x1xf32> to vector<8x32xf32>
    %79 = arith.subf %62, %78 : vector<8x32xf32>
    %cst_42 = arith.constant 9.99999974E-6 : f32
    %80 = vector.broadcast %cst_42 : f32 to vector<8x1xf32>
    %81 = arith.addf %77, %80 : vector<8x1xf32>
    %82 = math.rsqrt %81 : vector<8x1xf32>
    %83 = vector.broadcast %82 : vector<8x1xf32> to vector<8x32xf32>
    %84 = arith.mulf %79, %83 : vector<8x32xf32>
    %85 = vector.broadcast %64 : vector<1x32xf32> to vector<8x32xf32>
    %86 = arith.mulf %84, %85 : vector<8x32xf32>
    %87 = vector.broadcast %66 : vector<1x32xf32> to vector<8x32xf32>
    %88 = arith.addf %86, %87 : vector<8x32xf32>
    %89 = arith.truncf %88 : vector<8x32xf32> to vector<8x32xbf16>
    %c0_43 = arith.constant 0 : index
    %c0_44 = arith.constant 0 : index
    %c0_45 = arith.constant 0 : index
    %90 = vector.load %arg12[%c0_43, %c0_44, %c0_45] : memref<2x32x32xbf16, #tpu.memory_space<vmem>>, vector<1x32x32xbf16>
    %91 = vector.shape_cast %90 : vector<1x32x32xbf16> to vector<32x32xbf16>
    %cst_46 = arith.constant dense<0.000000e+00> : vector<8x32xf32>
    %92 = tpu.matmul %89, %91, %cst_46 {dimension_numbers = #tpu.dot_dimension_numbers<[1], [0], [0], [1], [0, 0, 1, 1], [], []>} : vector<8x32xbf16>, vector<32x32xbf16>, vector<8x32xf32> -> vector<8x32xf32>
    %c0_47 = arith.constant 0 : index
    %c0_48 = arith.constant 0 : index
    %c0_49 = arith.constant 0 : index
    %93 = vector.load %arg13[%c0_47, %c0_48, %c0_49] : memref<2x1x32xf32, #tpu.memory_space<vmem>>, vector<1x1x32xf32>
    %94 = vector.shape_cast %93 : vector<1x1x32xf32> to vector<1x32xf32>
    %95 = vector.broadcast %94 : vector<1x32xf32> to vector<8x32xf32>
    %96 = arith.addf %92, %95 : vector<8x32xf32>
    %cst_50 = arith.constant 0.000000e+00 : f32
    %97 = vector.broadcast %cst_50 : f32 to vector<8x32xf32>
    %98 = arith.maximumf %96, %97 : vector<8x32xf32>
    %99 = arith.truncf %98 : vector<8x32xf32> to vector<8x32xbf16>
    %c0_51 = arith.constant 0 : index
    %c0_52 = arith.constant 0 : index
    %c0_53 = arith.constant 0 : index
    %100 = vector.load %arg14[%c0_51, %c0_52, %c0_53] : memref<2x32x32xbf16, #tpu.memory_space<vmem>>, vector<1x32x32xbf16>
    %101 = vector.shape_cast %100 : vector<1x32x32xbf16> to vector<32x32xbf16>
    %cst_54 = arith.constant dense<0.000000e+00> : vector<8x32xf32>
    %102 = tpu.matmul %99, %101, %cst_54 {dimension_numbers = #tpu.dot_dimension_numbers<[1], [0], [0], [1], [0, 0, 1, 1], [], []>} : vector<8x32xbf16>, vector<32x32xbf16>, vector<8x32xf32> -> vector<8x32xf32>
    %c0_55 = arith.constant 0 : index
    %c0_56 = arith.constant 0 : index
    %c0_57 = arith.constant 0 : index
    %103 = vector.load %arg15[%c0_55, %c0_56, %c0_57] : memref<2x1x32xf32, #tpu.memory_space<vmem>>, vector<1x1x32xf32>
    %104 = vector.shape_cast %103 : vector<1x1x32xf32> to vector<1x32xf32>
    %105 = vector.broadcast %104 : vector<1x32xf32> to vector<8x32xf32>
    %106 = arith.addf %102, %105 : vector<8x32xf32>
    %107 = arith.addf %88, %106 : vector<8x32xf32>
    %c0_58 = arith.constant 0 : index
    %c0_59 = arith.constant 0 : index
    %c0_60 = arith.constant 0 : index
    %108 = vector.load %arg16[%c0_58, %c0_59, %c0_60] : memref<2x1x32xf32, #tpu.memory_space<vmem>>, vector<1x1x32xf32>
    %109 = vector.shape_cast %108 : vector<1x1x32xf32> to vector<1x32xf32>
    %c0_61 = arith.constant 0 : index
    %c0_62 = arith.constant 0 : index
    %c0_63 = arith.constant 0 : index
    %110 = vector.load %arg17[%c0_61, %c0_62, %c0_63] : memref<2x1x32xf32, #tpu.memory_space<vmem>>, vector<1x1x32xf32>
    %111 = vector.shape_cast %110 : vector<1x1x32xf32> to vector<1x32xf32>
    %cst_64 = arith.constant dense<0.000000e+00> : vector<8xf32>
    %112 = vector.multi_reduction <add>, %107, %cst_64 [1] : vector<8x32xf32> to vector<8xf32>
    %113 = vector.shape_cast %112 : vector<8xf32> to vector<8x1xf32>
    %cst_65 = arith.constant 3.200000e+01 : f32
    %114 = vector.broadcast %cst_65 : f32 to vector<8x1xf32>
    %115 = arith.divf %113, %114 : vector<8x1xf32>
    %116 = arith.mulf %107, %107 : vector<8x32xf32>
    %cst_66 = arith.constant dense<0.000000e+00> : vector<8xf32>
    %117 = vector.multi_reduction <add>, %116, %cst_66 [1] : vector<8x32xf32> to vector<8xf32>
    %118 = vector.shape_cast %117 : vector<8xf32> to vector<8x1xf32>
    %cst_67 = arith.constant 3.200000e+01 : f32
    %119 = vector.broadcast %cst_67 : f32 to vector<8x1xf32>
    %120 = arith.divf %118, %119 : vector<8x1xf32>
    %121 = arith.mulf %115, %115 : vector<8x1xf32>
    %122 = arith.subf %120, %121 : vector<8x1xf32>
    %123 = vector.broadcast %115 : vector<8x1xf32> to vector<8x32xf32>
    %124 = arith.subf %107, %123 : vector<8x32xf32>
    %cst_68 = arith.constant 9.99999974E-6 : f32
    %125 = vector.broadcast %cst_68 : f32 to vector<8x1xf32>
    %126 = arith.addf %122, %125 : vector<8x1xf32>
    %127 = math.rsqrt %126 : vector<8x1xf32>
    %128 = vector.broadcast %127 : vector<8x1xf32> to vector<8x32xf32>
    %129 = arith.mulf %124, %128 : vector<8x32xf32>
    %130 = vector.broadcast %109 : vector<1x32xf32> to vector<8x32xf32>
    %131 = arith.mulf %129, %130 : vector<8x32xf32>
    %132 = vector.broadcast %111 : vector<1x32xf32> to vector<8x32xf32>
    %133 = arith.addf %131, %132 : vector<8x32xf32>
    %134 = arith.truncf %133 : vector<8x32xf32> to vector<8x32xbf16>
    %c1 = arith.constant 1 : index
    %c0_69 = arith.constant 0 : index
    %c0_70 = arith.constant 0 : index
    %135 = vector.load %arg6[%c1, %c0_69, %c0_70] : memref<2x32x96xbf16, #tpu.memory_space<vmem>>, vector<1x32x96xbf16>
    %136 = vector.shape_cast %135 : vector<1x32x96xbf16> to vector<32x96xbf16>
    %cst_71 = arith.constant dense<0.000000e+00> : vector<8x96xf32>
    %137 = tpu.matmul %134, %136, %cst_71 {dimension_numbers = #tpu.dot_dimension_numbers<[1], [0], [0], [1], [0, 0, 1, 1], [], []>} : vector<8x32xbf16>, vector<32x96xbf16>, vector<8x96xf32> -> vector<8x96xf32>
    %c1_72 = arith.constant 1 : index
    %c0_73 = arith.constant 0 : index
    %c0_74 = arith.constant 0 : index
    %138 = vector.load %arg7[%c1_72, %c0_73, %c0_74] : memref<2x1x96xf32, #tpu.memory_space<vmem>>, vector<1x1x96xf32>
    %139 = vector.shape_cast %138 : vector<1x1x96xf32> to vector<1x96xf32>
    %140 = vector.broadcast %139 : vector<1x96xf32> to vector<8x96xf32>
    %141 = arith.addf %137, %140 : vector<8x96xf32>
    %142 = vector.extract_strided_slice %141 {offsets = [0, 0], sizes = [8, 32], strides = [1, 1]} : vector<8x96xf32> to vector<8x32xf32>
    %143 = vector.extract_strided_slice %141 {offsets = [0, 32], sizes = [8, 32], strides = [1, 1]} : vector<8x96xf32> to vector<8x32xf32>
    %144 = vector.extract_strided_slice %141 {offsets = [0, 64], sizes = [8, 32], strides = [1, 1]} : vector<8x96xf32> to vector<8x32xf32>
    %145 = vector.shape_cast %142 : vector<8x32xf32> to vector<1x8x32xf32>
    %146 = arith.truncf %145 : vector<1x8x32xf32> to vector<1x8x32xbf16>
    %147 = vector.shape_cast %143 : vector<8x32xf32> to vector<1x8x32xf32>
    %148 = arith.truncf %147 : vector<1x8x32xf32> to vector<1x8x32xbf16>
    %149 = vector.shape_cast %144 : vector<8x32xf32> to vector<1x8x32xf32>
    %150 = arith.truncf %149 : vector<1x8x32xf32> to vector<1x8x32xbf16>
    "tpu.trace_start"() <{level = 10 : i32, message = "gtd,gsd->gts"}> : () -> ()
    %cst_75 = arith.constant dense<0.000000e+00> : vector<1x8x8xf32>
    %151 = tpu.matmul %146, %148, %cst_75 {dimension_numbers = #tpu.dot_dimension_numbers<[2], [2], [1], [1], [0, 0, 0, 1, 1, 1], [0], [0]>} : vector<1x8x32xbf16>, vector<1x8x32xbf16>, vector<1x8x8xf32> -> vector<1x8x8xf32>
    "tpu.trace_stop"() : () -> ()
    %cst_76 = arith.constant dense<0xFF800000> : vector<1x8xf32>
    %152 = vector.multi_reduction <maximumf>, %151, %cst_76 [2] : vector<1x8x8xf32> to vector<1x8xf32>
    %153 = vector.shape_cast %152 : vector<1x8xf32> to vector<1x8x1xf32>
    %154 = vector.broadcast %153 : vector<1x8x1xf32> to vector<1x8x8xf32>
    %155 = arith.subf %151, %154 : vector<1x8x8xf32>
    %156 = math.exp %155 : vector<1x8x8xf32>
    %cst_77 = arith.constant dense<0.000000e+00> : vector<1x8xf32>
    %157 = vector.multi_reduction <add>, %156, %cst_77 [2] : vector<1x8x8xf32> to vector<1x8xf32>
    %158 = vector.shape_cast %157 : vector<1x8xf32> to vector<1x8x1xf32>
    %159 = tpu.reciprocal %158 {approx = true} : vector<1x8x1xf32> -> vector<1x8x1xf32>
    %160 = vector.broadcast %159 : vector<1x8x1xf32> to vector<1x8x8xf32>
    %161 = arith.mulf %156, %160 : vector<1x8x8xf32>
    %162 = arith.truncf %161 : vector<1x8x8xf32> to vector<1x8x8xbf16>
    "tpu.trace_start"() <{level = 10 : i32, message = "gts,gsd->gtd"}> : () -> ()
    %cst_78 = arith.constant dense<0.000000e+00> : vector<1x8x32xf32>
    %163 = tpu.matmul %162, %150, %cst_78 {dimension_numbers = #tpu.dot_dimension_numbers<[2], [1], [1], [2], [0, 0, 0, 1, 1, 2], [0], [0]>} : vector<1x8x8xbf16>, vector<1x8x32xbf16>, vector<1x8x32xf32> -> vector<1x8x32xf32>
    "tpu.trace_stop"() : () -> ()
    %164 = vector.shape_cast %163 : vector<1x8x32xf32> to vector<8x32xf32>
    %165 = arith.truncf %164 : vector<8x32xf32> to vector<8x32xbf16>
    %c1_79 = arith.constant 1 : index
    %c0_80 = arith.constant 0 : index
    %c0_81 = arith.constant 0 : index
    %166 = vector.load %arg8[%c1_79, %c0_80, %c0_81] : memref<2x32x32xbf16, #tpu.memory_space<vmem>>, vector<1x32x32xbf16>
    %167 = vector.shape_cast %166 : vector<1x32x32xbf16> to vector<32x32xbf16>
    %cst_82 = arith.constant dense<0.000000e+00> : vector<8x32xf32>
    %168 = tpu.matmul %165, %167, %cst_82 {dimension_numbers = #tpu.dot_dimension_numbers<[1], [0], [0], [1], [0, 0, 1, 1], [], []>} : vector<8x32xbf16>, vector<32x32xbf16>, vector<8x32xf32> -> vector<8x32xf32>
    %c1_83 = arith.constant 1 : index
    %c0_84 = arith.constant 0 : index
    %c0_85 = arith.constant 0 : index
    %169 = vector.load %arg9[%c1_83, %c0_84, %c0_85] : memref<2x1x32xf32, #tpu.memory_space<vmem>>, vector<1x1x32xf32>
    %170 = vector.shape_cast %169 : vector<1x1x32xf32> to vector<1x32xf32>
    %171 = vector.broadcast %170 : vector<1x32xf32> to vector<8x32xf32>
    %172 = arith.addf %168, %171 : vector<8x32xf32>
    %173 = arith.addf %133, %172 : vector<8x32xf32>
    %c1_86 = arith.constant 1 : index
    %c0_87 = arith.constant 0 : index
    %c0_88 = arith.constant 0 : index
    %174 = vector.load %arg10[%c1_86, %c0_87, %c0_88] : memref<2x1x32xf32, #tpu.memory_space<vmem>>, vector<1x1x32xf32>
    %175 = vector.shape_cast %174 : vector<1x1x32xf32> to vector<1x32xf32>
    %c1_89 = arith.constant 1 : index
    %c0_90 = arith.constant 0 : index
    %c0_91 = arith.constant 0 : index
    %176 = vector.load %arg11[%c1_89, %c0_90, %c0_91] : memref<2x1x32xf32, #tpu.memory_space<vmem>>, vector<1x1x32xf32>
    %177 = vector.shape_cast %176 : vector<1x1x32xf32> to vector<1x32xf32>
    %cst_92 = arith.constant dense<0.000000e+00> : vector<8xf32>
    %178 = vector.multi_reduction <add>, %173, %cst_92 [1] : vector<8x32xf32> to vector<8xf32>
    %179 = vector.shape_cast %178 : vector<8xf32> to vector<8x1xf32>
    %cst_93 = arith.constant 3.200000e+01 : f32
    %180 = vector.broadcast %cst_93 : f32 to vector<8x1xf32>
    %181 = arith.divf %179, %180 : vector<8x1xf32>
    %182 = arith.mulf %173, %173 : vector<8x32xf32>
    %cst_94 = arith.constant dense<0.000000e+00> : vector<8xf32>
    %183 = vector.multi_reduction <add>, %182, %cst_94 [1] : vector<8x32xf32> to vector<8xf32>
    %184 = vector.shape_cast %183 : vector<8xf32> to vector<8x1xf32>
    %cst_95 = arith.constant 3.200000e+01 : f32
    %185 = vector.broadcast %cst_95 : f32 to vector<8x1xf32>
    %186 = arith.divf %184, %185 : vector<8x1xf32>
    %187 = arith.mulf %181, %181 : vector<8x1xf32>
    %188 = arith.subf %186, %187 : vector<8x1xf32>
    %189 = vector.broadcast %181 : vector<8x1xf32> to vector<8x32xf32>
    %190 = arith.subf %173, %189 : vector<8x32xf32>
    %cst_96 = arith.constant 9.99999974E-6 : f32
    %191 = vector.broadcast %cst_96 : f32 to vector<8x1xf32>
    %192 = arith.addf %188, %191 : vector<8x1xf32>
    %193 = math.rsqrt %192 : vector<8x1xf32>
    %194 = vector.broadcast %193 : vector<8x1xf32> to vector<8x32xf32>
    %195 = arith.mulf %190, %194 : vector<8x32xf32>
    %196 = vector.broadcast %175 : vector<1x32xf32> to vector<8x32xf32>
    %197 = arith.mulf %195, %196 : vector<8x32xf32>
    %198 = vector.broadcast %177 : vector<1x32xf32> to vector<8x32xf32>
    %199 = arith.addf %197, %198 : vector<8x32xf32>
    %200 = arith.truncf %199 : vector<8x32xf32> to vector<8x32xbf16>
    %c1_97 = arith.constant 1 : index
    %c0_98 = arith.constant 0 : index
    %c0_99 = arith.constant 0 : index
    %201 = vector.load %arg12[%c1_97, %c0_98, %c0_99] : memref<2x32x32xbf16, #tpu.memory_space<vmem>>, vector<1x32x32xbf16>
    %202 = vector.shape_cast %201 : vector<1x32x32xbf16> to vector<32x32xbf16>
    %cst_100 = arith.constant dense<0.000000e+00> : vector<8x32xf32>
    %203 = tpu.matmul %200, %202, %cst_100 {dimension_numbers = #tpu.dot_dimension_numbers<[1], [0], [0], [1], [0, 0, 1, 1], [], []>} : vector<8x32xbf16>, vector<32x32xbf16>, vector<8x32xf32> -> vector<8x32xf32>
    %c1_101 = arith.constant 1 : index
    %c0_102 = arith.constant 0 : index
    %c0_103 = arith.constant 0 : index
    %204 = vector.load %arg13[%c1_101, %c0_102, %c0_103] : memref<2x1x32xf32, #tpu.memory_space<vmem>>, vector<1x1x32xf32>
    %205 = vector.shape_cast %204 : vector<1x1x32xf32> to vector<1x32xf32>
    %206 = vector.broadcast %205 : vector<1x32xf32> to vector<8x32xf32>
    %207 = arith.addf %203, %206 : vector<8x32xf32>
    %cst_104 = arith.constant 0.000000e+00 : f32
    %208 = vector.broadcast %cst_104 : f32 to vector<8x32xf32>
    %209 = arith.maximumf %207, %208 : vector<8x32xf32>
    %210 = arith.truncf %209 : vector<8x32xf32> to vector<8x32xbf16>
    %c1_105 = arith.constant 1 : index
    %c0_106 = arith.constant 0 : index
    %c0_107 = arith.constant 0 : index
    %211 = vector.load %arg14[%c1_105, %c0_106, %c0_107] : memref<2x32x32xbf16, #tpu.memory_space<vmem>>, vector<1x32x32xbf16>
    %212 = vector.shape_cast %211 : vector<1x32x32xbf16> to vector<32x32xbf16>
    %cst_108 = arith.constant dense<0.000000e+00> : vector<8x32xf32>
    %213 = tpu.matmul %210, %212, %cst_108 {dimension_numbers = #tpu.dot_dimension_numbers<[1], [0], [0], [1], [0, 0, 1, 1], [], []>} : vector<8x32xbf16>, vector<32x32xbf16>, vector<8x32xf32> -> vector<8x32xf32>
    %c1_109 = arith.constant 1 : index
    %c0_110 = arith.constant 0 : index
    %c0_111 = arith.constant 0 : index
    %214 = vector.load %arg15[%c1_109, %c0_110, %c0_111] : memref<2x1x32xf32, #tpu.memory_space<vmem>>, vector<1x1x32xf32>
    %215 = vector.shape_cast %214 : vector<1x1x32xf32> to vector<1x32xf32>
    %216 = vector.broadcast %215 : vector<1x32xf32> to vector<8x32xf32>
    %217 = arith.addf %213, %216 : vector<8x32xf32>
    %218 = arith.addf %199, %217 : vector<8x32xf32>
    %c1_112 = arith.constant 1 : index
    %c0_113 = arith.constant 0 : index
    %c0_114 = arith.constant 0 : index
    %219 = vector.load %arg16[%c1_112, %c0_113, %c0_114] : memref<2x1x32xf32, #tpu.memory_space<vmem>>, vector<1x1x32xf32>
    %220 = vector.shape_cast %219 : vector<1x1x32xf32> to vector<1x32xf32>
    %c1_115 = arith.constant 1 : index
    %c0_116 = arith.constant 0 : index
    %c0_117 = arith.constant 0 : index
    %221 = vector.load %arg17[%c1_115, %c0_116, %c0_117] : memref<2x1x32xf32, #tpu.memory_space<vmem>>, vector<1x1x32xf32>
    %222 = vector.shape_cast %221 : vector<1x1x32xf32> to vector<1x32xf32>
    %cst_118 = arith.constant dense<0.000000e+00> : vector<8xf32>
    %223 = vector.multi_reduction <add>, %218, %cst_118 [1] : vector<8x32xf32> to vector<8xf32>
    %224 = vector.shape_cast %223 : vector<8xf32> to vector<8x1xf32>
    %cst_119 = arith.constant 3.200000e+01 : f32
    %225 = vector.broadcast %cst_119 : f32 to vector<8x1xf32>
    %226 = arith.divf %224, %225 : vector<8x1xf32>
    %227 = arith.mulf %218, %218 : vector<8x32xf32>
    %cst_120 = arith.constant dense<0.000000e+00> : vector<8xf32>
    %228 = vector.multi_reduction <add>, %227, %cst_120 [1] : vector<8x32xf32> to vector<8xf32>
    %229 = vector.shape_cast %228 : vector<8xf32> to vector<8x1xf32>
    %cst_121 = arith.constant 3.200000e+01 : f32
    %230 = vector.broadcast %cst_121 : f32 to vector<8x1xf32>
    %231 = arith.divf %229, %230 : vector<8x1xf32>
    %232 = arith.mulf %226, %226 : vector<8x1xf32>
    %233 = arith.subf %231, %232 : vector<8x1xf32>
    %234 = vector.broadcast %226 : vector<8x1xf32> to vector<8x32xf32>
    %235 = arith.subf %218, %234 : vector<8x32xf32>
    %cst_122 = arith.constant 9.99999974E-6 : f32
    %236 = vector.broadcast %cst_122 : f32 to vector<8x1xf32>
    %237 = arith.addf %233, %236 : vector<8x1xf32>
    %238 = math.rsqrt %237 : vector<8x1xf32>
    %239 = vector.broadcast %238 : vector<8x1xf32> to vector<8x32xf32>
    %240 = arith.mulf %235, %239 : vector<8x32xf32>
    %241 = vector.broadcast %220 : vector<1x32xf32> to vector<8x32xf32>
    %242 = arith.mulf %240, %241 : vector<8x32xf32>
    %243 = vector.broadcast %222 : vector<1x32xf32> to vector<8x32xf32>
    %244 = arith.addf %242, %243 : vector<8x32xf32>
    %245 = vector.shape_cast %244 : vector<8x32xf32> to vector<1x8x32xf32>
    %cst_123 = arith.constant dense<0.000000e+00> : vector<1x32xf32>
    %246 = vector.multi_reduction <add>, %245, %cst_123 [1] : vector<1x8x32xf32> to vector<1x32xf32>
    %247 = arith.truncf %246 : vector<1x32xf32> to vector<1x32xbf16>
    %c0_124 = arith.constant 0 : index
    %c0_125 = arith.constant 0 : index
    %248 = vector.load %arg18[%c0_124, %c0_125] : memref<32x1xbf16, #tpu.memory_space<vmem>>, vector<32x1xbf16>
    %cst_126 = arith.constant dense<0.000000e+00> : vector<1x1xf32>
    %249 = tpu.matmul %247, %248, %cst_126 {dimension_numbers = #tpu.dot_dimension_numbers<[1], [0], [0], [1], [0, 0, 1, 1], [], []>} : vector<1x32xbf16>, vector<32x1xbf16>, vector<1x1xf32> -> vector<1x1xf32>
    %c0_127 = arith.constant 0 : index
    %c0_128 = arith.constant 0 : index
    %250 = vector.load %arg19[%c0_127, %c0_128] : memref<1x1xf32, #tpu.memory_space<vmem>>, vector<1x1xf32>
    %cst_129 = arith.constant 8.000000e+00 : f32
    %251 = vector.broadcast %cst_129 : f32 to vector<1x1xf32>
    %252 = arith.mulf %251, %250 : vector<1x1xf32>
    %253 = arith.addf %249, %252 : vector<1x1xf32>
    %254 = vector.shape_cast %253 : vector<1x1xf32> to vector<1x1x1xf32>
    %c0_130 = arith.constant 0 : index
    %c0_131 = arith.constant 0 : index
    %c0_132 = arith.constant 0 : index
    %255 = vector.load %arg20[%c0_130, %c0_131, %c0_132] : memref<1x1x1xf32, #tpu.memory_space<vmem>>, vector<1x1x1xf32>
    tpu.vector_store %arg20[%c0_130, %c0_131, %c0_132], %254 {strides = array<i32>} : memref<1x1x1xf32, #tpu.memory_space<vmem>>, vector<1x1x1xf32>,
    return
  }
  func.func @transform_0(%arg0: i32) -> (i32, i32) {
    %c0_i32 = arith.constant 0 : i32
    %c0_i32_0 = arith.constant 0 : i32
    return %arg0, %c0_i32 : i32, i32
  }
  func.func @transform_1(%arg0: i32) -> (i32, i32) {
    %c0_i32 = arith.constant 0 : i32
    %c0_i32_0 = arith.constant 0 : i32
    %c0_i32_1 = arith.constant 0 : i32
    return %c0_i32, %c0_i32_0 : i32, i32
  }
  func.func @transform_2(%arg0: i32) -> (i32, i32) {
    %c0_i32 = arith.constant 0 : i32
    %c0_i32_0 = arith.constant 0 : i32
    %c0_i32_1 = arith.constant 0 : i32
    return %c0_i32, %c0_i32_0 : i32, i32
  }
  func.func @transform_3(%arg0: i32) -> (i32, i32) {
    %c0_i32 = arith.constant 0 : i32
    %c0_i32_0 = arith.constant 0 : i32
    %c0_i32_1 = arith.constant 0 : i32
    return %c0_i32, %c0_i32_0 : i32, i32
  }
  func.func @transform_4(%arg0: i32) -> (i32, i32) {
    %c0_i32 = arith.constant 0 : i32
    %c0_i32_0 = arith.constant 0 : i32
    %c0_i32_1 = arith.constant 0 : i32
    return %c0_i32, %c0_i32_0 : i32, i32
  }
  func.func @transform_5(%arg0: i32) -> (i32, i32, i32) {
    %c0_i32 = arith.constant 0 : i32
    %c0_i32_0 = arith.constant 0 : i32
    %c0_i32_1 = arith.constant 0 : i32
    %c0_i32_2 = arith.constant 0 : i32
    return %c0_i32, %c0_i32_0, %c0_i32_1 : i32, i32, i32
  }
  func.func @transform_6(%arg0: i32) -> (i32, i32, i32) {
    %c0_i32 = arith.constant 0 : i32
    %c0_i32_0 = arith.constant 0 : i32
    %c0_i32_1 = arith.constant 0 : i32
    %c0_i32_2 = arith.constant 0 : i32
    return %c0_i32, %c0_i32_0, %c0_i32_1 : i32, i32, i32
  }
  func.func @transform_7(%arg0: i32) -> (i32, i32, i32) {
    %c0_i32 = arith.constant 0 : i32
    %c0_i32_0 = arith.constant 0 : i32
    %c0_i32_1 = arith.constant 0 : i32
    %c0_i32_2 = arith.constant 0 : i32
    return %c0_i32, %c0_i32_0, %c0_i32_1 : i32, i32, i32
  }
  func.func @transform_8(%arg0: i32) -> (i32, i32, i32) {
    %c0_i32 = arith.constant 0 : i32
    %c0_i32_0 = arith.constant 0 : i32
    %c0_i32_1 = arith.constant 0 : i32
    %c0_i32_2 = arith.constant 0 : i32
    return %c0_i32, %c0_i32_0, %c0_i32_1 : i32, i32, i32
  }
  func.func @transform_9(%arg0: i32) -> (i32, i32, i32) {
    %c0_i32 = arith.constant 0 : i32
    %c0_i32_0 = arith.constant 0 : i32
    %c0_i32_1 = arith.constant 0 : i32
    %c0_i32_2 = arith.constant 0 : i32
    return %c0_i32, %c0_i32_0, %c0_i32_1 : i32, i32, i32
  }
  func.func @transform_10(%arg0: i32) -> (i32, i32, i32) {
    %c0_i32 = arith.constant 0 : i32
    %c0_i32_0 = arith.constant 0 : i32
    %c0_i32_1 = arith.constant 0 : i32
    %c0_i32_2 = arith.constant 0 : i32
    return %c0_i32, %c0_i32_0, %c0_i32_1 : i32, i32, i32
  }
  func.func @transform_11(%arg0: i32) -> (i32, i32, i32) {
    %c0_i32 = arith.constant 0 : i32
    %c0_i32_0 = arith.constant 0 : i32
    %c0_i32_1 = arith.constant 0 : i32
    %c0_i32_2 = arith.constant 0 : i32
    return %c0_i32, %c0_i32_0, %c0_i32_1 : i32, i32, i32
  }
  func.func @transform_12(%arg0: i32) -> (i32, i32, i32) {
    %c0_i32 = arith.constant 0 : i32
    %c0_i32_0 = arith.constant 0 : i32
    %c0_i32_1 = arith.constant 0 : i32
    %c0_i32_2 = arith.constant 0 : i32
    return %c0_i32, %c0_i32_0, %c0_i32_1 : i32, i32, i32
  }
  func.func @transform_13(%arg0: i32) -> (i32, i32, i32) {
    %c0_i32 = arith.constant 0 : i32
    %c0_i32_0 = arith.constant 0 : i32
    %c0_i32_1 = arith.constant 0 : i32
    %c0_i32_2 = arith.constant 0 : i32
    return %c0_i32, %c0_i32_0, %c0_i32_1 : i32, i32, i32
  }
  func.func @transform_14(%arg0: i32) -> (i32, i32, i32) {
    %c0_i32 = arith.constant 0 : i32
    %c0_i32_0 = arith.constant 0 : i32
    %c0_i32_1 = arith.constant 0 : i32
    %c0_i32_2 = arith.constant 0 : i32
    return %c0_i32, %c0_i32_0, %c0_i32_1 : i32, i32, i32
  }
  func.func @transform_15(%arg0: i32) -> (i32, i32, i32) {
    %c0_i32 = arith.constant 0 : i32
    %c0_i32_0 = arith.constant 0 : i32
    %c0_i32_1 = arith.constant 0 : i32
    %c0_i32_2 = arith.constant 0 : i32
    return %c0_i32, %c0_i32_0, %c0_i32_1 : i32, i32, i32
  }
  func.func @transform_16(%arg0: i32) -> (i32, i32, i32) {
    %c0_i32 = arith.constant 0 : i32
    %c0_i32_0 = arith.constant 0 : i32
    %c0_i32_1 = arith.constant 0 : i32
    %c0_i32_2 = arith.constant 0 : i32
    return %c0_i32, %c0_i32_0, %c0_i32_1 : i32, i32, i32
  }
  func.func @transform_17(%arg0: i32) -> (i32, i32) {
    %c0_i32 = arith.constant 0 : i32
    %c0_i32_0 = arith.constant 0 : i32
    %c0_i32_1 = arith.constant 0 : i32
    return %c0_i32, %c0_i32_0 : i32, i32
  }
  func.func @transform_18(%arg0: i32) -> (i32, i32) {
    %c0_i32 = arith.constant 0 : i32
    %c0_i32_0 = arith.constant 0 : i32
    %c0_i32_1 = arith.constant 0 : i32
    return %c0_i32, %c0_i32_0 : i32, i32
  }
  func.func @transform_19(%arg0: i32) -> (i32, i32, i32) {
    %c0_i32 = arith.constant 0 : i32
    %c0_i32_0 = arith.constant 0 : i32
    %c0_i32_1 = arith.constant 0 : i32
    return %arg0, %c0_i32, %c0_i32_0 : i32, i32, i32
  }
}

</mosaic_0001>

<bundles_post_ra>
// kernel: tpu_custom_call.1
= control target key start
LH: loop header
LB: loop body
LE: loop exit
PB: predicated region body
PF: predicated region fallthrough
CT: control target
= control target key end

     0   :  { %s3475_s0 = inlined_call_operand.hbm [shape: f32[16,24], index: 0, kind: input, shape index: {}]   ;;  %s3476_s1 = inlined_call_operand.hbm [shape: bf16[24,32], index: 1, kind: input, shape index: {}]   ;;  %s3477_s2 = inlined_call_operand.hbm [shape: f32[1,32], index: 2, kind: input, shape index: {}]   ;;  %s3478_s3 = inlined_call_operand.hbm [shape: bf16[32,32], index: 3, kind: input, shape index: {}]   ;;  %s3479_s4 = inlined_call_operand.hbm [shape: f32[1,32], index: 4, kind: input, shape index: {}]   ;;  %s3480_s5 = inlined_call_operand.vmem [shape: bf16[2,32,96], index: 5, kind: input, shape index: {}]   ;;  %s3481_s6 = inlined_call_operand.vmem [shape: f32[2,1,96], index: 6, kind: input, shape index: {}]   ;;  %s3482_s7 = inlined_call_operand.hbm [shape: bf16[2,32,32], index: 7, kind: input, shape index: {}]   ;;  %s3483_s8 = inlined_call_operand.hbm [shape: f32[2,1,32], index: 8, kind: input, shape index: {}]   ;;  %s3484_s9 = inlined_call_operand.hbm [shape: f32[2,1,32], index: 9, kind: input, shape index: {}]   ;;  %s3485_s10 = inlined_call_operand.hbm [shape: f32[2,1,32], index: 10, kind: input, shape index: {}]   ;;  %s3486_s11 = inlined_call_operand.hbm [shape: bf16[2,32,32], index: 11, kind: input, shape index: {}]   ;;  %s3487_s12 = inlined_call_operand.hbm [shape: f32[2,1,32], index: 12, kind: input, shape index: {}]   ;;  %s3488_s13 = inlined_call_operand.vmem [shape: bf16[2,32,32], index: 13, kind: input, shape index: {}]   ;;  %s3489_s14 = inlined_call_operand.vmem [shape: f32[2,1,32], index: 14, kind: input, shape index: {}]   ;;  %s3490_s15 = inlined_call_operand.vmem [shape: f32[2,1,32], index: 15, kind: input, shape index: {}]   ;;  %s3491_s16 = inlined_call_operand.vmem [shape: f32[2,1,32], index: 16, kind: input, shape index: {}]   ;;  %s3492_s17 = inlined_call_operand.vmem [shape: bf16[32,1], index: 17, kind: input, shape index: {}]   ;;  %s3493_s18 = inlined_call_operand.<no memory space> [shape: f32[1,1], index: 18, kind: input, shape index: {}]   ;;  %s3494_s19 = inlined_call_operand.vmem [shape: f32[2,1,1], index: 19, kind: output, shape index: {}]  }
   0x1   :  { %3513 = sst [smem:[#allocation26_spill]] %s3475_s0  ;;  %v24_v0 = vstv %s3493_s18 }
   0x2   :  { %3514 = sst [smem:[#allocation27_spill]] %s3476_s1  ;;  %25 = vst [vmem:[#allocation2] sm:$0x1] %v24_v0 }
   0x3   :  { %3515 = sst [smem:[#allocation28_spill]] %s3477_s2 }
   0x4   :  { %3516 = sst [smem:[#allocation29_spill]] %s3478_s3 }
   0x5   :  { %3517 = sst [smem:[#allocation30_spill]] %s3480_s5 }
   0x6   :  { %3518 = sst [smem:[#allocation31_spill]] %s3481_s6 }
   0x7   :  { %3519 = sst [smem:[#allocation32_spill]] %s3482_s7 }
   0x8   :  { %3520 = sst [smem:[#allocation33_spill]] %s3488_s13 }
   0x9   :  { %3521 = sst [smem:[#allocation34_spill]] %s3489_s14 }
   0xa   :  { %3522 = sst [smem:[#allocation35_spill]] %s3490_s15 }
   0xb   :  { %3523 = sst [smem:[#allocation36_spill]] %s3491_s16 }
   0xc   :  { %3524 = sst [smem:[#allocation37_spill]] %s3492_s17 }
   0xd   :  { %3525 = sst [smem:[#allocation38_spill]] %s3494_s19 }
   0xe   :  { %26 = vsyncpa [#allocation4], 0 }
   0xf   :  { %28 = vsyncpa [#allocation4 + $0x1], 0 }
  0x10   :  { %29 = vsyncpa [#allocation6], 0 }
  0x11   :  { %30 = vsyncpa [#allocation9], 0 }
  0x12   :  { %31 = vsyncpa [#allocation12], 0 }
  0x13   :  { %32 = vsyncpa [#allocation15], 0 }
  0x14   :  { %33 = vsyncpa [#allocation18], 0  ;;  %s2951_s20 = smov 0   ;;  %s2953_s21 = smov 0  }
  0x15   :  { %s2955_s1 = smov 0   ;;  %s2957_s22 = smov 0  }
  0x16 LB: > { %s2829_s18 = smov [#allocation5]   ;;  %s2972_s23 = sadd.s32 4294967295, %s2827_s22   ;;  %s2827_s22 = sphi %s2957_s22, %s3561_s22   ;;  %s2823_s1 = sphi %s2955_s1, %s3560_s1   ;;  %s2819_s21 = sphi %s2953_s21, %s3559_s21   ;;  %s2815_s20 = sphi %s2951_s20, %s3558_s20  }
  0x17   : > { %s486_s2 = sshll.u32 %s2829_s18, 4  ;;  %p2029_p0 = scmp.ge.s32.totalorder %s2827_s22, 1  ;;  %s2977_s2 = int_to_ptr.vmem [resolvable:$true] %s486_s2 }
  0x18   : > { %p3507_p1 = scmp.eq.s32.totalorder %s2972_s23, 0  ;;  %p474_p2 = scmp.lt.s32.totalorder %s2827_s22, 3 }
  0x19   : > { %s2830_s25 = smov [#allocation8]   ;;  %s2831_s27 = smov [#allocation11]  }
  0x1a   : > { %p2979_p3 = pnand %p2029_p0, %p474_p2  ;;  %s510_s3 = sshll.u32 %s2830_s25, 4  ;;  %s2991_s3 = int_to_ptr.vmem [resolvable:$true] %s510_s3 }
  0x1b   : > { %s540_s28 = sshll.u32 %s2831_s27, 4  ;;  %s3528_s30 = sld [smem:[#allocation27_spill]]  ;;  %s2993_s28 = int_to_ptr.vmem [resolvable:$true] %s540_s28 }
  0x1c   : > { %s3526_s24 = scalar_select %p2979_p3, 1, 0 }
  0x1d   : > { %p2319_p4 = pneg %p2979_p3 }
  0x1f   : > { %p2987_p5 = pnand %p2319_p4, %p3507_p1 }
  0x21   : > { %s2463_s18 = scalar_lea.hbm %s3528_s30, 192  ;;  %p3003_p7 = pneg %p2987_p5 }
  0x22   : > { %p2464_p6 = scmp.ne.s32.totalorder %s3528_s30, %s2463_s18  ;;  %p2470_p10 = scmp.lt.u32.totalorder %s2463_s18, %s3528_s30 }
  0x24   : > { %p2466_p8 = pnand %p3003_p7, %p2464_p6 }
  0x26   : > { %p2467_p9 = pneg %p2466_p8 }
  0x28   : > { %p2472_p11 = pnand %p2470_p10, %p2467_p9 }
  0x2a   : > { %2475 = shalt.err (!%p2472_p11)
}
  0x2b   : > { %s2476_s17 = scalar_lea.vmem %s2977_s2, 192  ;;  %p2484_p2 = scmp.lt.s32.totalorder %s2977_s2, %s2977_s2 }
  0x2c   : > { %p2477_p12 = scmp.ne.s32.totalorder %s2977_s2, %s2476_s17  ;;  %p2485_p4 = scmp.lt.s32.totalorder %s2476_s17, %s2476_s17 }
  0x2e   : > { %p2479_p13 = pnand %p2477_p12, %p3003_p7  ;;  %p2486_p6 = por %p2485_p4, %p2484_p2 }
  0x30   : > { %p2480_p0 = pneg %p2479_p13 }
  0x32   : > { %p2487_p8 = pnand %p2486_p6, %p2480_p0 }
  0x34   : > { %2490 = shalt.err (!%p2487_p8)
}
  0x35   : > { %s2832_s19 = smov 64   ;;  %s2833_s16 = smov 4  }
  0x36   : > { %2322 = dma.hbm_to_vmem [thread:$0]  (!%p2987_p5), %s3528_s30, 192, %s2977_s2, [#allocation6], %s2832_s19, %s2832_s19, %s2833_s16  }
  0x37   : > { %s3530_s15 = sld [smem:[#allocation29_spill]] }
  0x3d   : > { %s2491_s17 = scalar_lea.hbm %s3530_s15, 256 }
  0x3e   : > { %p2492_p9 = scmp.ne.s32.totalorder %s3530_s15, %s2491_s17  ;;  %p2498_p12 = scmp.lt.u32.totalorder %s2491_s17, %s3530_s15 }
  0x40   : > { %p2494_p10 = pnand %p2492_p9, %p3003_p7 }
  0x42   : > { %p2495_p11 = pneg %p2494_p10 }
  0x44   : > { %p2500_p13 = pnand %p2498_p12, %p2495_p11 }
  0x46   : > { %2503 = shalt.err (!%p2500_p13)
}
  0x47   : > { %s2504_s2 = scalar_lea.vmem %s2991_s3, 256  ;;  %p2512_p6 = scmp.lt.s32.totalorder %s2991_s3, %s2991_s3 }
  0x48   : > { %p2505_p0 = scmp.ne.s32.totalorder %s2991_s3, %s2504_s2  ;;  %p2513_p8 = scmp.lt.s32.totalorder %s2504_s2, %s2504_s2 }
  0x4a   : > { %p2507_p2 = pnand %p2505_p0, %p3003_p7  ;;  %p2514_p9 = por %p2513_p8, %p2512_p6 }
  0x4c   : > { %p2508_p4 = pneg %p2507_p2 }
  0x4e   : > { %p2515_p10 = pnand %p2514_p9, %p2508_p4 }
  0x50   : > { %2518 = shalt.err (!%p2515_p10)
}
  0x51   : > { %2328 = dma.hbm_to_vmem [thread:$0]  (!%p2987_p5), %s3530_s15, 256, %s2991_s3, [#allocation9], %s2832_s19, %s2832_s19, %s2833_s16  }
  0x52   : > { %s3531_s7 = sld [smem:[#allocation32_spill]] }
  0x58   : > { %s2519_s29 = scalar_lea.hbm %s3531_s7, 512 }
  0x59   : > { %p2520_p11 = scmp.ne.s32.totalorder %s3531_s7, %s2519_s29  ;;  %p2526_p0 = scmp.lt.u32.totalorder %s2519_s29, %s3531_s7 }
  0x5b   : > { %p2522_p12 = pnand %p2520_p11, %p3003_p7 }
  0x5d   : > { %p2523_p13 = pneg %p2522_p12 }
  0x5f   : > { %p2528_p2 = pnand %p2526_p0, %p2523_p13 }
  0x61   : > { %2531 = shalt.err (!%p2528_p2)
}
  0x62   : > { %s2532_s3 = scalar_lea.vmem %s2993_s28, 512  ;;  %p2540_p9 = scmp.lt.s32.totalorder %s2993_s28, %s2993_s28 }
  0x63   : > { %p2533_p4 = scmp.ne.s32.totalorder %s2993_s28, %s2532_s3  ;;  %p2541_p10 = scmp.lt.s32.totalorder %s2532_s3, %s2532_s3 }
  0x65   : > { %p2535_p6 = pnand %p2533_p4, %p3003_p7  ;;  %p2542_p11 = por %p2541_p10, %p2540_p9 }
  0x67   : > { %p2536_p8 = pneg %p2535_p6 }
  0x69   : > { %p2543_p12 = pnand %p2542_p11, %p2536_p8 }
  0x6b   : > { %2546 = shalt.err (!%p2543_p12)
}
  0x6c   : > { %2334 = dma.hbm_to_vmem [thread:$0]  (!%p2987_p5), %s3531_s7, 512, %s2993_s28, [#allocation12], %s2832_s19, %s2832_s19, %s2833_s16  }
  0x6d   : > { %s2834_s6 = smov [#allocation14]   ;;  %s2835_s14 = smov [#allocation17]  }
  0x6e   : > { %s566_s13 = sshll.u32 %s2834_s6, 4  ;;  %s592_s29 = sshll.u32 %s2835_s14, 4  ;;  %s567_s13 = int_to_ptr.vmem [resolvable:$true] %s566_s13  ;;  %s593_s29 = int_to_ptr.vmem [resolvable:$true] %s592_s29 }
  0x6f   : > { %s2547_s27 = scalar_lea.hbm %s3484_s9, 32 }
  0x70   : > { %p2548_p13 = scmp.ne.s32.totalorder %s3484_s9, %s2547_s27  ;;  %p2554_p4 = scmp.lt.u32.totalorder %s2547_s27, %s3484_s9 }
  0x72   : > { %p2550_p0 = pnand %p2548_p13, %p3003_p7 }
  0x74   : > { %p2551_p2 = pneg %p2550_p0 }
  0x76   : > { %p2556_p6 = pnand %p2554_p4, %p2551_p2 }
  0x78   : > { %2559 = shalt.err (!%p2556_p6)
}
  0x79   : > { %s2560_s28 = scalar_lea.vmem %s567_s13, 32  ;;  %p2568_p11 = scmp.lt.s32.totalorder %s567_s13, %s567_s13 }
  0x7a   : > { %p2561_p8 = scmp.ne.s32.totalorder %s567_s13, %s2560_s28  ;;  %p2569_p12 = scmp.lt.s32.totalorder %s2560_s28, %s2560_s28 }
  0x7c   : > { %p2563_p9 = pnand %p2561_p8, %p3003_p7  ;;  %p2570_p1 = por %p2569_p12, %p2568_p11 }
  0x7e   : > { %p2564_p10 = pneg %p2563_p9 }
  0x80   : > { %p2571_p3 = pnand %p2570_p1, %p2564_p10 }
  0x82   : > { %2574 = shalt.err (!%p2571_p3)
}
  0x83   : > { %s3509_s5 = smov 16   ;;  %s3511_s6 = smov 1  }
  0x84   : > { %2340 = dma.hbm_to_vmem [thread:$0]  (!%p2987_p5), %s3484_s9, 32, %s567_s13, [#allocation15], %s3509_s5, %s3509_s5, %s3511_s6  }
  0x85   : > { %s2575_s27 = scalar_lea.hbm %s3486_s11, 512 }
  0x86   : > { %p2576_p1 = scmp.ne.s32.totalorder %s3486_s11, %s2575_s27  ;;  %p2582_p0 = scmp.lt.u32.totalorder %s2575_s27, %s3486_s11 }
  0x88   : > { %p2578_p3 = pnand %p2576_p1, %p3003_p7 }
  0x8a   : > { %p2579_p13 = pneg %p2578_p3 }
  0x8c   : > { %p2584_p2 = pnand %p2582_p0, %p2579_p13 }
  0x8e   : > { %2587 = shalt.err (!%p2584_p2)
}
  0x8f   : > { %s2588_s15 = scalar_lea.vmem %s593_s29, 512  ;;  %p2596_p9 = scmp.lt.s32.totalorder %s593_s29, %s593_s29 }
  0x90   : > { %p2589_p4 = scmp.ne.s32.totalorder %s593_s29, %s2588_s15  ;;  %p2597_p10 = scmp.lt.s32.totalorder %s2588_s15, %s2588_s15 }
  0x92   : > { %p2591_p6 = pnand %p2589_p4, %p3003_p7  ;;  %p2598_p11 = por %p2597_p10, %p2596_p9 }
  0x94   : > { %p2592_p8 = pneg %p2591_p6 }
  0x96   : > { %p2599_p12 = pnand %p2598_p11, %p2592_p8 }
  0x98   : > { %2602 = shalt.err (!%p2599_p12)
}
  0x99   : > { %2346 = dma.hbm_to_vmem [thread:$0]  (!%p2987_p5), %s3486_s11, 512, %s593_s29, [#allocation18], %s2832_s19, %s2832_s19, %s2833_s16  }
  0x9a   : > { %s2838_s0 = smov [#allocation7]   ;;  %s2839_s27 = smov [#allocation10]  }
  0x9b   : > { %s500_s18 = sshll.u32 %s2838_s0, 4  ;;  %s524_s17 = sshll.u32 %s2839_s27, 4  ;;  %s501_s18 = int_to_ptr.vmem [resolvable:$true] %s500_s18  ;;  %s525_s17 = int_to_ptr.vmem [resolvable:$true] %s524_s17 }
  0x9c   : > { %s3532_s28 = sld [smem:[#allocation28_spill]] }
  0xa2   : > { %s2603_s15 = scalar_lea.hbm %s3532_s28, 16 }
  0xa3   : > { %p2604_p1 = scmp.ne.s32.totalorder %s3532_s28, %s2603_s15  ;;  %p2610_p0 = scmp.lt.u32.totalorder %s2603_s15, %s3532_s28 }
  0xa5   : > { %p2606_p3 = pnand %p2604_p1, %p3003_p7 }
  0xa7   : > { %p2607_p13 = pneg %p2606_p3 }
  0xa9   : > { %p2612_p2 = pnand %p2610_p0, %p2607_p13 }
  0xab   : > { %2615 = shalt.err (!%p2612_p2)
}
  0xac   : > { %s2616_s19 = scalar_lea.vmem %s501_s18, 16  ;;  %s2623_s16 = scalar_lea.vmem %s501_s18, 32 }
  0xad   : > { %p2617_p4 = scmp.ne.s32.totalorder %s501_s18, %s2616_s19  ;;  %p2624_p9 = scmp.lt.s32.totalorder %s501_s18, %s501_s18 }
  0xae   : > { %p2625_p10 = scmp.lt.s32.totalorder %s2623_s16, %s2616_s19 }
  0xaf   : > { %p2619_p6 = pnand %p2617_p4, %p3003_p7 }
  0xb0   : > { %p2626_p11 = por %p2625_p10, %p2624_p9 }
  0xb1   : > { %p2620_p8 = pneg %p2619_p6 }
  0xb3   : > { %p2627_p12 = pnand %p2626_p11, %p2620_p8 }
  0xb5   : > { %2630 = shalt.err (!%p2627_p12)
}
  0xb6   : > { %2325 = dma.hbm_to_vmem [thread:$0]  (!%p2987_p5), %s3532_s28, 16, %s501_s18, [#allocation6]  }
  0xb7   : > { %s2631_s14 = scalar_lea.hbm %s3479_s4, 16 }
  0xb8   : > { %p2632_p1 = scmp.ne.s32.totalorder %s3479_s4, %s2631_s14  ;;  %p2638_p0 = scmp.lt.u32.totalorder %s2631_s14, %s3479_s4 }
  0xba   : > { %p2634_p3 = pnand %p2632_p1, %p3003_p7 }
  0xbc   : > { %p2635_p13 = pneg %p2634_p3 }
  0xbe   : > { %p2640_p2 = pnand %p2638_p0, %p2635_p13 }
  0xc0   : > { %2643 = shalt.err (!%p2640_p2)
}
  0xc1   : > { %s2644_s15 = scalar_lea.vmem %s525_s17, 16  ;;  %s2651_s18 = scalar_lea.vmem %s525_s17, 32 }
  0xc2   : > { %p2645_p4 = scmp.ne.s32.totalorder %s525_s17, %s2644_s15  ;;  %p2652_p9 = scmp.lt.s32.totalorder %s525_s17, %s525_s17 }
  0xc3   : > { %p2653_p10 = scmp.lt.s32.totalorder %s2651_s18, %s2644_s15 }
  0xc4   : > { %p2647_p6 = pnand %p2645_p4, %p3003_p7 }
  0xc5   : > { %p2654_p11 = por %p2653_p10, %p2652_p9 }
  0xc6   : > { %p2648_p8 = pneg %p2647_p6 }
  0xc8   : > { %p2655_p12 = pnand %p2654_p11, %p2648_p8 }
  0xca   : > { %2658 = shalt.err (!%p2655_p12)
}
  0xcb   : > { %2331 = dma.hbm_to_vmem [thread:$0]  (!%p2987_p5), %s3479_s4, 16, %s525_s17, [#allocation9]  }
  0xcc   : > { %s2840_s16 = smov [#allocation13]   ;;  %s2841_s5 = smov [#allocation16]  }
  0xcd   : > { %s553_s29 = sshll.u32 %s2840_s16, 4  ;;  %s579_s7 = sshll.u32 %s2841_s5, 4  ;;  %s554_s29 = int_to_ptr.vmem [resolvable:$true] %s553_s29  ;;  %s580_s7 = int_to_ptr.vmem [resolvable:$true] %s579_s7 }
  0xce   : > { %s2659_s0 = scalar_lea.hbm %s3483_s8, 32 }
  0xcf   : > { %p2660_p1 = scmp.ne.s32.totalorder %s3483_s8, %s2659_s0  ;;  %p2666_p0 = scmp.lt.u32.totalorder %s2659_s0, %s3483_s8 }
  0xd1   : > { %p2662_p3 = pnand %p2660_p1, %p3003_p7 }
  0xd3   : > { %p2663_p13 = pneg %p2662_p3 }
  0xd5   : > { %p2668_p2 = pnand %p2666_p0, %p2663_p13 }
  0xd7   : > { %2671 = shalt.err (!%p2668_p2)
}
  0xd8   : > { %s2672_s17 = scalar_lea.vmem %s554_s29, 32  ;;  %p2680_p9 = scmp.lt.s32.totalorder %s554_s29, %s554_s29 }
  0xd9   : > { %p2673_p4 = scmp.ne.s32.totalorder %s554_s29, %s2672_s17  ;;  %p2681_p10 = scmp.lt.s32.totalorder %s2672_s17, %s2672_s17 }
  0xdb   : > { %p2675_p6 = pnand %p2673_p4, %p3003_p7  ;;  %p2682_p11 = por %p2681_p10, %p2680_p9 }
  0xdd   : > { %p2676_p8 = pneg %p2675_p6 }
  0xdf   : > { %p2683_p12 = pnand %p2682_p11, %p2676_p8 }
  0xe1   : > { %2686 = shalt.err (!%p2683_p12)
}
  0xe2   : > { %s3533_s18 = smov 1   ;;  %s3534_s13 = smov 16  }
  0xe3   : > { %2337 = dma.hbm_to_vmem [thread:$0]  (!%p2987_p5), %s3483_s8, 32, %s554_s29, [#allocation12], %s3534_s13, %s3534_s13, %s3533_s18  }
  0xe4   : > { %s2687_s14 = scalar_lea.hbm %s3485_s10, 32 }
  0xe5   : > { %p2688_p1 = scmp.ne.s32.totalorder %s3485_s10, %s2687_s14  ;;  %p2694_p0 = scmp.lt.u32.totalorder %s2687_s14, %s3485_s10 }
  0xe7   : > { %p2690_p3 = pnand %p2688_p1, %p3003_p7 }
  0xe9   : > { %p2691_p13 = pneg %p2690_p3 }
  0xeb   : > { %p2696_p2 = pnand %p2694_p0, %p2691_p13 }
  0xed   : > { %2699 = shalt.err (!%p2696_p2)
}
  0xee   : > { %s2700_s15 = scalar_lea.vmem %s580_s7, 32  ;;  %p2708_p9 = scmp.lt.s32.totalorder %s580_s7, %s580_s7 }
  0xef   : > { %p2701_p4 = scmp.ne.s32.totalorder %s580_s7, %s2700_s15  ;;  %p2709_p10 = scmp.lt.s32.totalorder %s2700_s15, %s2700_s15 }
  0xf1   : > { %p2703_p6 = pnand %p2701_p4, %p3003_p7  ;;  %p2710_p11 = por %p2709_p10, %p2708_p9 }
  0xf3   : > { %p2704_p8 = pneg %p2703_p6 }
  0xf5   : > { %p2711_p12 = pnand %p2710_p11, %p2704_p8 }
  0xf7   : > { %2714 = shalt.err (!%p2711_p12)
}
  0xf8   : > { %2343 = dma.hbm_to_vmem [thread:$0]  (!%p2987_p5), %s3485_s10, 32, %s580_s7, [#allocation15], %s3534_s13, %s3534_s13, %s3533_s18  }
  0xf9   : > { %s2842_s19 = smov [#allocation19]   ;;  %s2715_s14 = scalar_lea.hbm %s3487_s12, 32 }
  0xfa   : > { %s605_s16 = sshll.u32 %s2842_s19, 4  ;;  %p2716_p1 = scmp.ne.s32.totalorder %s3487_s12, %s2715_s14  ;;  %s606_s16 = int_to_ptr.vmem [resolvable:$true] %s605_s16 }
  0xfb   : > { %p2722_p0 = scmp.lt.u32.totalorder %s2715_s14, %s3487_s12 }
  0xfc   : > { %p2718_p3 = pnand %p2716_p1, %p3003_p7 }
  0xfe   : > { %p2719_p13 = pneg %p2718_p3 }
 0x100   : > { %p2724_p2 = pnand %p2722_p0, %p2719_p13 }
 0x102   : > { %2727 = shalt.err (!%p2724_p2)
}
 0x103   : > { %s2728_s7 = scalar_lea.vmem %s606_s16, 32  ;;  %p2736_p9 = scmp.lt.s32.totalorder %s606_s16, %s606_s16 }
 0x104   : > { %p2729_p4 = scmp.ne.s32.totalorder %s606_s16, %s2728_s7  ;;  %p2737_p10 = scmp.lt.s32.totalorder %s2728_s7, %s2728_s7 }
 0x106   : > { %p2731_p6 = pnand %p2729_p4, %p3003_p7  ;;  %p2738_p11 = por %p2737_p10, %p2736_p9 }
 0x108   : > { %p2732_p8 = pneg %p2731_p6 }
 0x10a   : > { %p2739_p12 = pnand %p2738_p11, %p2732_p8 }
 0x10c   : > { %2742 = shalt.err (!%p2739_p12)
}
 0x10d   : > { %2349 = dma.hbm_to_vmem [thread:$0]  (!%p2987_p5), %s3487_s12, 32, %s606_s16, [#allocation18], %s3534_s13, %s3534_s13, %s3533_s18  }
 0x10e   : > { %s3221_s26 = sadd.s32 1, %s2827_s22   ;;  %s46_s25 = sadd.s32 1, %s2823_s1 }
 0x10f   : > { %s43_s17 = ssub.s32 %s2827_s22, %s3221_s26  ;;  %p53_p7 = scmp.ne.s32.totalorder %s2823_s1, %s2819_s21 }
 0x110   : > { %p44_p1 = scmp.eq.s32.totalorder %s43_s17, 0  ;;  %p54_p3 = scmp.eq.s32.totalorder %s2827_s22, 0 }
 0x111   : > { %p59_p13 = scmp.ne.s32.totalorder %s2819_s21, %s2815_s20  ;;  %p2364_p0 = scmp.lt.s32.totalorder %s2827_s22, 2 }
 0x112   : > { %s3233_s19 = scalar_select %p44_p1, %s2823_s1, %s46_s25  }
 0x113   : > { %p55_p2 = por %p54_p3, %p53_p7  ;;  %p3535_p4 = scmp.eq.s32.totalorder %s2972_s23, 0 }
 0x114   : > { %s637_s6 = sand.u32 1, %s2823_s1   ;;  %s2042_s18 = sshll.u32 %s2827_s22, 7 }
 0x115   : > { %p3237_p6 = por %p3535_p4, %p59_p13  ;;  %s2041_s13 = sshll.u32 %s637_s6, 3 }
 0x116   : > { %s3537_s0 = sld [smem:[#allocation26_spill]]  ;;  %s641_s20 = scalar_lea.vmem [#allocation3], %s2041_s13 }
 0x117   : > { %s648_s3 = sshll.u32 %s641_s20, 4  ;;  %p3248_p5 = pnand %p2364_p0, %p55_p2  ;;  %s3252_s3 = int_to_ptr.vmem [resolvable:$true] %s648_s3 }
 0x118   : > { %s638_s22 = scalar_lea.sflag [#allocation4], %s637_s6 }
 0x119   : > { %p2745_p9 = pneg %p3248_p5 }
 0x11c   : > { %s3246_s27 = scalar_lea.hbm %s3537_s0, %s2042_s18  ;;  %s2748_s25 = scalar_lea.hbm %s3537_s0, 256 }
 0x11d   : > { %s2743_s7 = scalar_lea.hbm %s3246_s27, 128  ;;  %p2749_p12 = scmp.lt.u32.totalorder %s3246_s27, %s3537_s0 }
 0x11e   : > { %p2744_p8 = scmp.ne.s32.totalorder %s3246_s27, %s2743_s7  ;;  %p2750_p7 = scmp.lt.u32.totalorder %s2748_s25, %s2743_s7 }
 0x11f   : > { %p2752_p3 = scmp.lt.u32.totalorder %s2743_s7, %s3246_s27 }
 0x120   : > { %p2746_p10 = pnand %p2745_p9, %p2744_p8  ;;  %p2751_p1 = por %p2750_p7, %p2749_p12 }
 0x122   : > { %p2747_p11 = pneg %p2746_p10  ;;  %p2753_p13 = por %p2752_p3, %p2751_p1 }
 0x124   : > { %p2754_p0 = pnand %p2753_p13, %p2747_p11 }
 0x126   : > { %2757 = shalt.err (!%p2754_p0)
}
 0x127   : > { %s2758_s6 = scalar_lea.vmem %s3252_s3, 128  ;;  %s2843_s13 = smov [#allocation3]  }
 0x128   : > { %p2759_p2 = scmp.ne.s32.totalorder %s3252_s3, %s2758_s6  ;;  %s2763_s16 = sshll.u32 %s2843_s13, 4  ;;  %s2764_s16 = int_to_ptr.vmem [resolvable:$false] %s2763_s16 }
 0x129   : > { %s2765_s14 = scalar_lea.vmem %s2764_s16, 256  ;;  %p2766_p10 = scmp.lt.s32.totalorder %s3252_s3, %s2764_s16 }
 0x12a   : > { %p2761_p4 = pnand %p2759_p2, %p2745_p9  ;;  %p2767_p12 = scmp.lt.s32.totalorder %s2765_s14, %s2758_s6 }
 0x12c   : > { %p2762_p8 = pneg %p2761_p4  ;;  %p2768_p7 = por %p2767_p12, %p2766_p10 }
 0x12e   : > { %p2769_p1 = pnand %p2768_p7, %p2762_p8 }
 0x130   : > { %2772 = shalt.err (!%p2769_p1)
}
 0x131   : > { %2353 = dma.hbm_to_vmem [thread:$0]  (!%p3248_p5), %s3246_s27, 128, %s3252_s3, %s638_s22  }
 0x132   : > { %p3539_p11 = scmp.ne.s32.totalorder %s3526_s24, 0 }
 0x133   : > { %s659_s20 = sand.u32 (!%p3539_p11), 1, %s2819_s21  }
 0x134   : > { %657 = sbr.rel (%p3539_p11) target bundleno = 5154 (0x1422), region = 96  ;;  %s2044_s7 = sshll.u32 (!%p3539_p11), %s659_s20, 3 }
 0x135   : > { %s660_s15 = scalar_lea.sflag (!%p3539_p11), [#allocation4], %s659_s20  ;;  %s663_s29 = scalar_lea.vmem (!%p3539_p11), [#allocation3], %s2044_s7 }
 0x13b   : > { %2790 = dma.done.wait (%p3237_p6), %s660_s15, 128  }
 0x13c   : > { %2792 = vsyncadd (%p3237_p6), %s660_s15, 4294967168  ;;  %p3540_p9 = scmp.eq.s32.totalorder %s2972_s23, 0 }
 0x13e   : > { %2794 = dma.done.wait (%p3540_p9), [#allocation6], 208   ;;  %p3541_p3 = pmov %p3540_p9 }
 0x140   : > { %2796 = vsyncadd (%p3541_p3), [#allocation6], 4294967088  ;;  %p3542_p5 = pmov %p3541_p3 }
 0x141   : > { %p3543_p13 = pmov %p3541_p3 }
 0x142   : > { %2798 = dma.done.wait (%p3542_p5), [#allocation9], 272  }
 0x143   : > { %2800 = vsyncadd (%p3543_p13), [#allocation9], 4294967024  ;;  %p3544_p0 = pmov %p3541_p3 }
 0x145   : > { %2802 = dma.done.wait (%p3544_p0), [#allocation12], 544   ;;  %p3545_p2 = pmov %p3544_p0 }
 0x146   : > { %p3546_p6 = pmov %p3544_p0 }
 0x147   : > { %2804 = vsyncadd (%p3545_p2), [#allocation12], 4294966752 }
 0x148   : > { %2806 = dma.done.wait (%p3546_p6), [#allocation15], 64   ;;  %p3547_p4 = pmov %p3544_p0 }
 0x149   : > { %p3548_p8 = pmov %p3544_p0 }
 0x14a   : > { %2808 = vsyncadd (%p3547_p4), [#allocation15], 4294967232 }
 0x14b   : > { %2810 = dma.done.wait (%p3548_p8), [#allocation18], 544   ;;  %p3549_p10 = pmov %p3544_p0 }
 0x14c   : > { %v2844_v1 = vmov 0.0   ;;  %vm2845_vm0 = vmmov 0   ;;  %v2425_v2 = vld [vmem:[#allocation5] sm:$0xff]   ;;  %vm785_vm1 = vcmask 1043456   ;;  %v2426_v3 = vld [vmem:[#allocation5 + $0x8] ss:$0 sps:$4 sm:$0xff]  }
 0x14d   : > { %2812 = vsyncadd (%p3549_p10), [#allocation18], 4294966752  ;;  %2165 = vmatprep.subr.bf16.mxu0 %v2844_v1  ;;  %2169 = vmatprep.mubr.msk.bf16.mxu0 %vm2845_vm0, %v2844_v1  ;;  %v760_v4 = vld [vmem:[%s663_s29] sm:$0xff]  ;;  %v787_v5 = vsel %vm785_vm1, %v2426_v3, 0  ;;  %vm781_vm2 = vcmask 195584   ;;  %vm856_vm4 = vcmask 261120  }
 0x14e   : > { %2173 = vmatprep.subr.bf16.mxu1 %v2844_v1  ;;  %2177 = vmatprep.mubr.msk.bf16.mxu1 %vm2845_vm0, %v2844_v1  ;;  %v761_v6 = vpack.c.bf16 %v760_v4, %v760_v4  ;;  %v2427_v7 = vld [vmem:[#allocation8] sm:$0xff]   ;;  %v2428_v8 = vld [vmem:[#allocation8 + $0x8] sm:$0xff]   ;;  %v2055_v9 = vld [vmem:[#allocation7] ss:$0 sm:$0xff]  ;;  %s3550_s27 = sld [smem:[#allocation30_spill]]  ;;  %s3551_s17 = sld [smem:[#allocation31_spill]] }
 0x14f   : > { %2166 = vmatpush3.bf16.msra.mxu0 %v2425_v2  ;;  %2174 = vmatpush3.bf16.msra.mxu1 %v2427_v7  ;;  %v2059_v20 = vld [vmem:[#allocation10] ss:$0 sm:$0xff]  ;;  %s2846_s18 = smov 96   ;;  %vm1020_vm6 = vcmask 64512   ;;  %s2847_s6 = smov 64   ;;  %v2431_v48 = vld [vmem:[#allocation11] sm:$0xff]  }
 0x150   : > { %2167 = vmatprep.subr.bf16.mxu0 %v2844_v1  ;;  %2175 = vmatprep.subr.bf16.mxu1 %v2844_v1  ;;  %v2432_v55 = vld [vmem:[#allocation11 + $0x8] sm:$0xff]   ;;  %v2069_v61 = vld [vmem:[#allocation13] ss:$0 sm:$0xff]  ;;  %s3552_s14 = sld [smem:[#allocation33_spill]]  ;;  %s3553_s24 = sld [smem:[#allocation34_spill]]  ;;  %vm1872_vm7 = vcmask 0  }
 0x151   : > { %s3554_s16 = sld [smem:[#allocation35_spill]]  ;;  %s3555_s15 = sld [smem:[#allocation36_spill]] }
 0x152   : > { %s3556_s7 = sld [smem:[#allocation37_spill]]  ;;  %p756_p12 = scmp.lt.s32.totalorder %s2972_s23, 1 }
 0x153   : > { %2168 = vmatpush3.bf16.msra.mxu0 %v787_v5  ;;  %2176 = vmatpush3.bf16.msra.mxu1 %v2428_v8  ;;  %v2433_v8 = vld [vmem:[#allocation17] sm:$0xff]   ;;  %s3557_s13 = sld [smem:[#allocation38_spill]] }
 0x154   : > { %2181 = vmatprep.subr.bf16.mxu0 %v2844_v1  ;;  %2189 = vmatprep.subr.bf16.mxu1 %v2844_v1  ;;  %v2429_v18 = vld [vmem:[%s3550_s27] sm:$0xff]   ;;  %v2430_v19 = vld [vmem:[%s3550_s27 + $0x8] sm:$0xff]   ;;  %s3563_s23 = smov (!%p756_p12, %s2972_s23), 1 }
 0x155   : > { %v2063_v29 = vld [vmem:[%s3551_s17] ss:$0 sm:$0xff] }
 0x156   : > { %2170 = vmatmul.mubr.msk.bf16.vlgmr.msra.gmra.mrb[0].mxu0 %vm781_vm2, %v761_v6 }
 0x157   : > { %2185 = vmatprep.mubr.msk.bf16.mxu0 %vm2845_vm0, %v2844_v1  ;;  %2182 = vmatpush3.bf16.msra.mxu0 %v2429_v18 }
 0x158   : > { %2183 = vmatprep.subr.bf16.mxu0 %v2844_v1 }
 0x159   : > { %s758_s20 = scalar_lea.vmem %s3557_s13, %s3563_s23 }
 0x15b   : > { %2184 = vmatpush3.bf16.msra.mxu0 %v2430_v19  ;;  %v2073_v19 = vld [vmem:[#allocation14] ss:$0 sm:$0xff] }
 0x15c   : > { %2195 = vmatprep.subr.bf16.mxu0 %v2844_v1 }
 0x229   : > { %v823_v10 = vpop.f32.mrb[0].mxu0 }
 0x22a   : > { %v824_v11 = vadd.f32 %v2055_v9, %v823_v10  ;;  %v2171_v12 = vpop.f32.mrb[1].mxu0  ;;  %v2434_v9 = vld [vmem:[#allocation17 + $0x8] sm:$0xff]  }
 0x22b   : > { %v826_v13 = vpop.f32.mrb[2].mxu0 }
 0x22c   : > { %vm829_vm3 = vcmp.gt.f32.partialorder %v824_v11, 0.0  ;;  %v830_v14 = vmul.f32 0.01, %v824_v11  ;;  %v2172_v15 = vpop.f32.mrb[3].mxu0 }
 0x22e   : > { %v831_v16 = vsel %vm829_vm3, %v824_v11, %v830_v14 }
 0x22f   : > { %v832_v17 = vpack.c.bf16 %v831_v16, %v831_v16 }
 0x231   : > { %2178 = vmatmul.mubr.msk.bf16.vlgmr.msra.gmra.mrb[0].mxu1 %vm856_vm4, %v832_v17 }
 0x232   : > { %2191 = vmatprep.mubr.msk.bf16.mxu1 %vm2845_vm0, %v2844_v1 }
 0x304   : > { %v894_v21 = vpop.f32.mrb[0].mxu1 }
 0x305   : > { %v895_v22 = vadd.f32 %v2059_v20, %v894_v21  ;;  %v2179_v23 = vpop.f32.mrb[1].mxu1  ;;  %v2074_v21 = vld [vmem:[#allocation16] ss:$0 sm:$0xff] }
 0x306   : > { %v897_v24 = vpop.f32.mrb[2].mxu1 }
 0x307   : > { %vm900_vm5 = vcmp.gt.f32.partialorder %v895_v22, 0.0  ;;  %v901_v25 = vmul.f32 0.01, %v895_v22  ;;  %v2180_v26 = vpop.f32.mrb[3].mxu1 }
 0x308   : > { %v2436_v26 = vld [vmem:[%s3552_s14 + $0x8] sm:$0xff]  }
 0x309   : > { %v3330_v27 = vsel %vm900_vm5, %v895_v22, %v901_v25  ;;  %v2435_v25 = vld [vmem:[%s3552_s14] sm:$0xff]  }
 0x30a   : > { %v903_v28 = vpack.c.bf16 %v3330_v27, %v3330_v27 }
 0x30c   : > { %2186 = vmatmul.mubr.msk.bf16.vlgmr.msra.gmra.mrb[4].mxu0 %vm856_vm4, %v903_v28 }
 0x30d   : > { %2197 = vmatprep.mubr.msk.bf16.mxu0 %vm2845_vm0, %v2844_v1 }
 0x3df   : > { %v964_v30 = vpop.f32.mrb[4].mxu0 }
 0x3e0   : > { %v965_v31 = vadd.f32 %v2063_v29, %v964_v30  ;;  %v2187_v32 = vpop.f32.mrb[5].mxu0 }
 0x3e1   : > { %v967_v33 = vpop.f32.mrb[6].mxu0 }
 0x3e2   : > { %v970_v34 = vpack.c.bf16 %v965_v31, %v965_v31  ;;  %v2188_v35 = vpop.f32.mrb[7].mxu0 }
 0x3e3   : > { %v2079_v35 = vld [vmem:[%s3553_s24] ss:$0 sm:$0xff] }
 0x3e4   : > { %972 = vrot.lane.b32.xlu0 %v970_v34, %s2846_s18 }
 0x456   : > { %v973_v36 = vpop.permute.xlu0 %972 }
 0x457   : > { %v978_v37 = vsel %vm856_vm4, %v973_v36, 0 }
 0x458   : > { %2190 = vmatpush3.bf16.xpose.msra.mxu1 %v978_v37 }
 0x459   : > { %2201 = vmatprep.subr.bf16.mxu1 %v2844_v1 }
 0x45f   : > { %2192 = vmatmul.mubr.msk.bf16.vlgmr.msra.gmra.mrb[4].mxu1 %vm856_vm4, %v970_v34 }
 0x460   : > { %2205 = vmatprep.mubr.msk.bf16.mxu1 %vm2845_vm0, %v2844_v1  ;;  %2202 = vmatpush3.bf16.msra.mxu1 %v2431_v48 }
 0x461   : > { %2203 = vmatprep.subr.bf16.mxu1 %v2844_v1 }
 0x464   : > { %2204 = vmatpush3.bf16.msra.mxu1 %v2432_v55 }
 0x465   : > { %2217 = vmatprep.subr.bf16.mxu1 %v2844_v1 }
 0x532   : > { %v1014_v38 = vpop.f32.mrb[4].mxu1 }
 0x533   : > { %v2193_v39 = vpop.f32.mrb[5].mxu1  ;;  %v1021_v40 = vsel %vm1020_vm6, %v1014_v38, -inf }
 0x534   : > { %1022 = vmax.xlane.f32.xlu0 %v1021_v40  ;;  %v1017_v41 = vpop.f32.mrb[6].mxu1 }
 0x535   : > { %v2194_v42 = vpop.f32.mrb[7].mxu1 }
 0x5c1   : > { %v1023_v43 = vpop.xlane.xlu0 %1022 }
 0x5c2   : > { %v1024_v44 = vsub.f32 %v1014_v38, %v1023_v43 }
 0x5c4   : > { %v1025_v45 = vmul.f32 1.442695, %v1024_v44 }
 0x5c6   : > { %2447 = vpow2.f32 %v1025_v45  ;;  %v2437_v45 = vld [vmem:[%s3550_s27 + $0x10] sm:$0xff]  }
 0x5d0   : > { %v2448_v46 = vpop.eup %2447 }
 0x5d1   : > { %v1027_v47 = vsel %vm1020_vm6, %v2448_v46, 0.0 }
 0x5d2   : > { %1028 = vadd.xlane.f32.xlu1 %v1027_v47 }
 0x5e3   : > { %1033 = vrot.lane.b32.xlu1 %v970_v34, %s2847_s6 }
 0x65f   : > { %v1029_v49 = vpop.xlane.xlu1 %1028 }
 0x660   : > { %2449 = vrcp.f32 %v1029_v49 }
 0x663   : > { %v1034_v50 = vpop.permute.xlu1 %1033 }
 0x664   : > { %v1039_v51 = vsel %vm785_vm1, %v1034_v50, 0 }
 0x665   : > { %2196 = vmatpush3.bf16.msra.mxu0 %v1039_v51 }
 0x666   : > { %2209 = vmatprep.subr.bf16.mxu0 %v2844_v1 }
 0x66a   : > { %v2450_v52 = vpop.eup %2449 }
 0x66b   : > { %v1031_v53 = vmul.f32 %v2450_v52, %v2448_v46  ;;  %v2438_v46 = vld [vmem:[%s3550_s27 + $0x18] sm:$0xff]  }
 0x66d   : > { %v1032_v54 = vpack.c.bf16 %v1031_v53, %v1031_v53 }
 0x66f   : > { %2198 = vmatmul.mubr.msk.bf16.vlgmr.msra.gmra.mrb[8].mxu0 %vm1020_vm6, %v1032_v54 }
 0x670   : > { %2213 = vmatprep.mubr.msk.bf16.mxu0 %vm2845_vm0, %v2844_v1  ;;  %2210 = vmatpush3.bf16.msra.mxu0 %v2433_v8 }
 0x671   : > { %2211 = vmatprep.subr.bf16.mxu0 %v2844_v1 }
 0x674   : > { %2212 = vmatpush3.bf16.msra.mxu0 %v2434_v9 }
 0x675   : > { %2225 = vmatprep.subr.bf16.mxu0 %v2844_v1 }
 0x742   : > { %v1075_v56 = vpop.f32.mrb[8].mxu0 }
 0x743   : > { %v1081_v57 = vpack.c.bf16 %v1075_v56, %v1075_v56  ;;  %v2199_v58 = vpop.f32.mrb[9].mxu0  ;;  %v2083_v56 = vld [vmem:[%s3554_s16] ss:$0 sm:$0xff] }
 0x744   : > { %v1078_v59 = vpop.f32.mrb[10].mxu0  ;;  %v2084_v58 = vld [vmem:[%s3555_s15] ss:$0 sm:$0xff] }
 0x745   : > { %v2200_v60 = vpop.f32.mrb[11].mxu0  ;;  %2206 = vmatmul.mubr.msk.bf16.vlgmr.msra.gmra.mrb[8].mxu1 %vm856_vm4, %v1081_v57 }
 0x746   : > { %2221 = vmatprep.mubr.msk.bf16.mxu1 %vm2845_vm0, %v2844_v1  ;;  %2218 = vmatpush3.bf16.msra.mxu1 %v2435_v25  ;;  %v2440_v25 = vld [vmem:[#allocation11 + $0x18] sm:$0xff]  }
 0x747   : > { %2219 = vmatprep.subr.bf16.mxu1 %v2844_v1 }
 0x74a   : > { %2220 = vmatpush3.bf16.msra.mxu1 %v2436_v26 }
 0x74b   : > { %2233 = vmatprep.subr.bf16.mxu1 %v2844_v1 }
 0x818   : > { %v1142_v62 = vpop.f32.mrb[8].mxu1 }
 0x819   : > { %v1143_v63 = vadd.f32 %v2069_v61, %v1142_v62  ;;  %v2207_v0 = vpop.f32.mrb[9].mxu1  ;;  %v2090_v62 = vld [vmem:[%s3551_s17 + $0x1] ss:$0 sm:$0xff] }
 0x81a   : > { %v1145_v2 = vpop.f32.mrb[10].mxu1 }
 0x81b   : > { %v1148_v3 = vadd.f32 %v1143_v63, %v3330_v27  ;;  %v2208_v4 = vpop.f32.mrb[11].mxu1  ;;  %v2075_v27 = vld [vmem:[#allocation19] ss:$0 sm:$0xff] }
 0x81d   : > { %v1151_v5 = vsel %vm856_vm4, %v1148_v3, 0.0  ;;  %v1156_v6 = vmul.f32 %v1148_v3, %v1148_v3 }
 0x81e   : > { %1152 = vadd.xlane.f32.xlu1 %v1151_v5 }
 0x81f   : > { %v1157_v7 = vsel %vm856_vm4, %v1156_v6, 0.0 }
 0x820   : > { %1158 = vadd.xlane.f32.xlu0 %v1157_v7 }
 0x8ab   : > { %v1153_v10 = vpop.xlane.xlu1 %1152 }
 0x8ac   : > { %v1155_v11 = vmul.f32 0.03125, %v1153_v10 }
 0x8ad   : > { %v1159_v12 = vpop.xlane.xlu0 %1158 }
 0x8ae   : > { %v1161_v13 = vmul.f32 %v1155_v11, %v1155_v11  ;;  %v1160_v14 = vmul.f32 0.03125, %v1159_v12  ;;  %v1163_v17 = vsub.f32 %v1148_v3, %v1155_v11 }
 0x8b0   : > { %v1162_v15 = vsub.f32 %v1160_v14, %v1161_v13 }
 0x8b2   : > { %v1164_v16 = vadd.f32 1e-05, %v1162_v15 }
 0x8b4   : > { %2451 = vrsqrt.f32 %v1164_v16 }
 0x8be   : > { %v2452_v18 = vpop.eup %2451 }
 0x8bf   : > { %v1166_v20 = vmul.f32 %v2452_v18, %v1163_v17  ;;  %v2439_v18 = vld [vmem:[#allocation11 + $0x10] sm:$0xff]  }
 0x8c1   : > { %v1173_v22 = vmul.f32 %v2073_v19, %v1166_v20 }
 0x8c3   : > { %v1180_v23 = vadd.f32 %v2074_v21, %v1173_v22 }
 0x8c5   : > { %v1181_v24 = vpack.c.bf16 %v1180_v23, %v1180_v23 }
 0x8c7   : > { %2214 = vmatmul.mubr.msk.bf16.vlgmr.msra.gmra.mrb[12].mxu0 %vm856_vm4, %v1181_v24 }
 0x8c8   : > { %2229 = vmatprep.mubr.msk.bf16.mxu0 %vm2845_vm0, %v2844_v1  ;;  %2226 = vmatpush3.bf16.msra.mxu0 %v2437_v45 }
 0x8c9   : > { %2227 = vmatprep.subr.bf16.mxu0 %v2844_v1 }
 0x8cc   : > { %2228 = vmatpush3.bf16.msra.mxu0 %v2438_v46 }
 0x8cd   : > { %2239 = vmatprep.subr.bf16.mxu0 %v2844_v1 }
 0x99a   : > { %v1242_v28 = vpop.f32.mrb[12].mxu0 }
 0x99b   : > { %v1243_v29 = vadd.f32 %v2075_v27, %v1242_v28  ;;  %v2215_v30 = vpop.f32.mrb[13].mxu0 }
 0x99c   : > { %v1245_v31 = vpop.f32.mrb[14].mxu0 }
 0x99d   : > { %v1248_v32 = vmax.f32 %v1243_v29, 0.0  ;;  %v2216_v33 = vpop.f32.mrb[15].mxu0  ;;  %v2096_v31 = vld [vmem:[#allocation13 + $0x1] ss:$0 sm:$0xff] }
 0x99f   : > { %v1249_v34 = vpack.c.bf16 %v1248_v32, %v1248_v32 }
 0x9a1   : > { %2222 = vmatmul.mubr.msk.bf16.vlgmr.msra.gmra.mrb[12].mxu1 %vm856_vm4, %v1249_v34 }
 0x9a2   : > { %2235 = vmatprep.mubr.msk.bf16.mxu1 %vm2845_vm0, %v2844_v1 }
 0xa74   : > { %v1310_v36 = vpop.f32.mrb[12].mxu1 }
 0xa75   : > { %v1311_v37 = vadd.f32 %v2079_v35, %v1310_v36  ;;  %v2223_v38 = vpop.f32.mrb[13].mxu1 }
 0xa76   : > { %v1313_v39 = vpop.f32.mrb[14].mxu1 }
 0xa77   : > { %v1316_v40 = vadd.f32 %v1311_v37, %v1180_v23  ;;  %v2224_v41 = vpop.f32.mrb[15].mxu1 }
 0xa78   : > { %v2441_v41 = vld [vmem:[#allocation17 + $0x10] sm:$0xff]  }
 0xa79   : > { %v1319_v42 = vsel %vm856_vm4, %v1316_v40, 0.0  ;;  %v1323_v43 = vmul.f32 %v1316_v40, %v1316_v40 }
 0xa7a   : > { %1320 = vadd.xlane.f32.xlu0 %v1319_v42  ;;  %v2442_v42 = vld [vmem:[#allocation17 + $0x18] sm:$0xff]  }
 0xa7b   : > { %v1324_v44 = vsel %vm856_vm4, %v1323_v43, 0.0 }
 0xa7e   : > { %1325 = vadd.xlane.f32.xlu0 %v1324_v44 }
 0xb07   : > { %v1321_v47 = vpop.xlane.xlu0 %1320 }
 0xb08   : > { %v1322_v48 = vmul.f32 0.03125, %v1321_v47 }
 0xb0a   : > { %v1328_v50 = vmul.f32 %v1322_v48, %v1322_v48  ;;  %v1330_v54 = vsub.f32 %v1316_v40, %v1322_v48 }
 0xb0b   : > { %v1326_v49 = vpop.xlane.xlu0 %1325 }
 0xb0c   : > { %v1327_v51 = vmul.f32 0.03125, %v1326_v49 }
 0xb0e   : > { %v1329_v52 = vsub.f32 %v1327_v51, %v1328_v50 }
 0xb10   : > { %v1331_v53 = vadd.f32 1e-05, %v1329_v52  ;;  %v2100_v52 = vld [vmem:[#allocation14 + $0x1] ss:$0 sm:$0xff] }
 0xb12   : > { %2453 = vrsqrt.f32 %v1331_v53 }
 0xb1c   : > { %v2454_v55 = vpop.eup %2453 }
 0xb1d   : > { %v1333_v57 = vmul.f32 %v2454_v55, %v1330_v54  ;;  %v2101_v54 = vld [vmem:[#allocation16 + $0x1] ss:$0 sm:$0xff] }
 0xb1f   : > { %v1340_v59 = vmul.f32 %v2083_v56, %v1333_v57 }
 0xb21   : > { %v1347_v60 = vadd.f32 %v2084_v58, %v1340_v59  ;;  %v2443_v58 = vld [vmem:[%s3552_s14 + $0x10] sm:$0xff]   ;;  %v2444_v59 = vld [vmem:[%s3552_s14 + $0x18] sm:$0xff]  }
 0xb23   : > { %v1348_v61 = vpack.c.bf16 %v1347_v60, %v1347_v60 }
 0xb25   : > { %2230 = vmatmul.mubr.msk.bf16.vlgmr.msra.gmra.mrb[16].mxu0 %vm856_vm4, %v1348_v61 }
 0xb26   : > { %2241 = vmatprep.mubr.msk.bf16.mxu0 %vm2845_vm0, %v2844_v1 }
 0xbf8   : > { %v1411_v63 = vpop.f32.mrb[16].mxu0 }
 0xbf9   : > { %v1412_v0 = vadd.f32 %v2090_v62, %v1411_v63  ;;  %v2231_v2 = vpop.f32.mrb[17].mxu0 }
 0xbfa   : > { %v1414_v3 = vpop.f32.mrb[18].mxu0 }
 0xbfb   : > { %v1417_v4 = vpack.c.bf16 %v1412_v0, %v1412_v0  ;;  %v2232_v5 = vpop.f32.mrb[19].mxu0 }
 0xbfc   : > { %v2111_v5 = vld [vmem:[%s3553_s24 + $0x1] ss:$0 sm:$0xff] }
 0xbfd   : > { %1419 = vrot.lane.b32.xlu0 %v1417_v4, %s2846_s18 }
 0xc6f   : > { %v1420_v6 = vpop.permute.xlu0 %1419 }
 0xc70   : > { %v1425_v7 = vsel %vm856_vm4, %v1420_v6, 0 }
 0xc71   : > { %2234 = vmatpush3.bf16.xpose.msra.mxu1 %v1425_v7 }
 0xc72   : > { %2245 = vmatprep.subr.bf16.mxu1 %v2844_v1 }
 0xc78   : > { %2236 = vmatmul.mubr.msk.bf16.vlgmr.msra.gmra.mrb[16].mxu1 %vm856_vm4, %v1417_v4 }
 0xc79   : > { %2249 = vmatprep.mubr.msk.bf16.mxu1 %vm2845_vm0, %v2844_v1  ;;  %2246 = vmatpush3.bf16.msra.mxu1 %v2439_v18 }
 0xc7a   : > { %2247 = vmatprep.subr.bf16.mxu1 %v2844_v1 }
 0xc7d   : > { %2248 = vmatpush3.bf16.msra.mxu1 %v2440_v25 }
 0xc7e   : > { %2261 = vmatprep.subr.bf16.mxu1 %v2844_v1 }
 0xd4b   : > { %v1461_v8 = vpop.f32.mrb[16].mxu1 }
 0xd4c   : > { %v2237_v9 = vpop.f32.mrb[17].mxu1  ;;  %v1467_v10 = vsel %vm1020_vm6, %v1461_v8, -inf }
 0xd4d   : > { %1468 = vmax.xlane.f32.xlu1 %v1467_v10  ;;  %v1464_v11 = vpop.f32.mrb[18].mxu1 }
 0xd4e   : > { %v2238_v12 = vpop.f32.mrb[19].mxu1 }
 0xdda   : > { %v1469_v13 = vpop.xlane.xlu1 %1468 }
 0xddb   : > { %v1470_v14 = vsub.f32 %v1461_v8, %v1469_v13 }
 0xddd   : > { %v1471_v15 = vmul.f32 1.442695, %v1470_v14 }
 0xddf   : > { %2455 = vpow2.f32 %v1471_v15  ;;  %v2445_v15 = vld [vmem:[%s3556_s7] sm:$0xff]  }
 0xde9   : > { %v2456_v16 = vpop.eup %2455 }
 0xdea   : > { %v1473_v17 = vsel %vm1020_vm6, %v2456_v16, 0.0 }
 0xdeb   : > { %1474 = vadd.xlane.f32.xlu1 %v1473_v17 }
 0xdfc   : > { %1479 = vrot.lane.b32.xlu1 %v1417_v4, %s2847_s6 }
 0xe78   : > { %v1475_v19 = vpop.xlane.xlu1 %1474 }
 0xe79   : > { %2457 = vrcp.f32 %v1475_v19 }
 0xe7c   : > { %v1480_v20 = vpop.permute.xlu1 %1479 }
 0xe7d   : > { %v1485_v21 = vsel %vm785_vm1, %v1480_v20, 0 }
 0xe7e   : > { %2240 = vmatpush3.bf16.msra.mxu0 %v1485_v21 }
 0xe7f   : > { %2253 = vmatprep.subr.bf16.mxu0 %v2844_v1 }
 0xe83   : > { %v2458_v22 = vpop.eup %2457 }
 0xe84   : > { %v1477_v23 = vmul.f32 %v2458_v22, %v2456_v16  ;;  %v2446_v16 = vld [vmem:[%s3556_s7 + $0x8] sm:$0xff]  }
 0xe86   : > { %v1478_v24 = vpack.c.bf16 %v1477_v23, %v1477_v23 }
 0xe88   : > { %2242 = vmatmul.mubr.msk.bf16.vlgmr.msra.gmra.mrb[20].mxu0 %vm1020_vm6, %v1478_v24 }
 0xe89   : > { %2257 = vmatprep.mubr.msk.bf16.mxu0 %vm2845_vm0, %v2844_v1  ;;  %2254 = vmatpush3.bf16.msra.mxu0 %v2441_v41 }
 0xe8a   : > { %2255 = vmatprep.subr.bf16.mxu0 %v2844_v1 }
 0xe8d   : > { %2256 = vmatpush3.bf16.msra.mxu0 %v2442_v42 }
 0xe8e   : > { %2269 = vmatprep.subr.bf16.mxu0 %v2844_v1 }
 0xf5b   : > { %v1521_v26 = vpop.f32.mrb[20].mxu0 }
 0xf5c   : > { %v1527_v27 = vpack.c.bf16 %v1521_v26, %v1521_v26  ;;  %v2243_v28 = vpop.f32.mrb[21].mxu0  ;;  %v2117_v26 = vld [vmem:[%s3554_s16 + $0x1] ss:$0 sm:$0xff] }
 0xf5d   : > { %v1524_v29 = vpop.f32.mrb[22].mxu0 }
 0xf5e   : > { %v2244_v30 = vpop.f32.mrb[23].mxu0  ;;  %2250 = vmatmul.mubr.msk.bf16.vlgmr.msra.gmra.mrb[20].mxu1 %vm856_vm4, %v1527_v27 }
 0xf5f   : > { %2265 = vmatprep.mubr.msk.bf16.mxu1 %vm2845_vm0, %v2844_v1  ;;  %2262 = vmatpush3.bf16.msra.mxu1 %v2443_v58 }
 0xf60   : > { %2263 = vmatprep.subr.bf16.mxu1 %v2844_v1 }
 0xf63   : > { %2264 = vmatpush3.bf16.msra.mxu1 %v2444_v59 }
0x1031   : > { %v1590_v32 = vpop.f32.mrb[20].mxu1 }
0x1032   : > { %v1591_v33 = vadd.f32 %v2096_v31, %v1590_v32  ;;  %v2251_v34 = vpop.f32.mrb[21].mxu1 }
0x1033   : > { %v1593_v35 = vpop.f32.mrb[22].mxu1 }
0x1034   : > { %v1596_v36 = vadd.f32 %v1591_v33, %v1347_v60  ;;  %v2252_v37 = vpop.f32.mrb[23].mxu1  ;;  %v2102_v60 = vld [vmem:[#allocation19 + $0x1] ss:$0 sm:$0xff] }
0x1036   : > { %v1601_v38 = vsel %vm856_vm4, %v1596_v36, 0.0  ;;  %v1605_v39 = vmul.f32 %v1596_v36, %v1596_v36 }
0x1037   : > { %1602 = vadd.xlane.f32.xlu0 %v1601_v38  ;;  %v1815_v38 = vld [vmem:[#allocation2] sm:$0x1] }
0x1038   : > { %v1606_v40 = vsel %vm856_vm4, %v1605_v39, 0.0  ;;  %v1816_v39 = vmul.f32 8.0, %v1815_v38 }
0x1039   : > { %1607 = vadd.xlane.f32.xlu1 %v1606_v40 }
0x10c4   : > { %v1603_v43 = vpop.xlane.xlu0 %1602 }
0x10c5   : > { %v1604_v44 = vmul.f32 0.03125, %v1603_v43 }
0x10c6   : > { %v1608_v45 = vpop.xlane.xlu1 %1607 }
0x10c7   : > { %v1610_v46 = vmul.f32 %v1604_v44, %v1604_v44  ;;  %v1609_v47 = vmul.f32 0.03125, %v1608_v45  ;;  %v1612_v50 = vsub.f32 %v1596_v36, %v1604_v44 }
0x10c9   : > { %v1611_v48 = vsub.f32 %v1609_v47, %v1610_v46 }
0x10cb   : > { %v1613_v49 = vadd.f32 1e-05, %v1611_v48 }
0x10cd   : > { %2459 = vrsqrt.f32 %v1613_v49 }
0x10d7   : > { %v2460_v51 = vpop.eup %2459 }
0x10d8   : > { %v1615_v53 = vmul.f32 %v2460_v51, %v1612_v50 }
0x10da   : > { %v1622_v55 = vmul.f32 %v2100_v52, %v1615_v53 }
0x10dc   : > { %v1629_v56 = vadd.f32 %v2101_v54, %v1622_v55 }
0x10de   : > { %v1630_v57 = vpack.c.bf16 %v1629_v56, %v1629_v56 }
0x10e0   : > { %2258 = vmatmul.mubr.msk.bf16.vlgmr.msra.gmra.mrb[24].mxu0 %vm856_vm4, %v1630_v57 }
0x10e1   : > { %2273 = vmatprep.mubr.msk.bf16.mxu0 %vm2845_vm0, %v2844_v1  ;;  %2270 = vmatpush3.bf16.msra.mxu0 %v2445_v15 }
0x10e2   : > { %2271 = vmatprep.subr.bf16.mxu0 %v2844_v1  ;;  %v2118_v1 = vld [vmem:[%s3555_s15 + $0x1] ss:$0 sm:$0xff] }
0x10e5   : > { %2272 = vmatpush3.bf16.msra.mxu0 %v2446_v16 }
0x11b3   : > { %v1693_v61 = vpop.f32.mrb[24].mxu0 }
0x11b4   : > { %v1694_v62 = vadd.f32 %v2102_v60, %v1693_v61  ;;  %v2259_v63 = vpop.f32.mrb[25].mxu0 }
0x11b5   : > { %v1696_v0 = vpop.f32.mrb[26].mxu0 }
0x11b6   : > { %v1699_v2 = vmax.f32 %v1694_v62, 0.0  ;;  %v2260_v3 = vpop.f32.mrb[27].mxu0 }
0x11b8   : > { %v1700_v4 = vpack.c.bf16 %v1699_v2, %v1699_v2 }
0x11ba   : > { %2266 = vmatmul.mubr.msk.bf16.vlgmr.msra.gmra.mrb[24].mxu1 %vm856_vm4, %v1700_v4 }
0x128d   : > { %v1763_v6 = vpop.f32.mrb[24].mxu1 }
0x128e   : > { %v1764_v7 = vadd.f32 %v2111_v5, %v1763_v6  ;;  %v2267_v8 = vpop.f32.mrb[25].mxu1 }
0x128f   : > { %v1766_v9 = vpop.f32.mrb[26].mxu1 }
0x1290   : > { %v1769_v10 = vadd.f32 %v1764_v7, %v1629_v56  ;;  %v2268_v11 = vpop.f32.mrb[27].mxu1 }
0x1292   : > { %v1774_v12 = vsel %vm856_vm4, %v1769_v10, 0.0  ;;  %v1778_v13 = vmul.f32 %v1769_v10, %v1769_v10 }
0x1293   : > { %1775 = vadd.xlane.f32.xlu0 %v1774_v12 }
0x1294   : > { %v1779_v14 = vsel %vm856_vm4, %v1778_v13, 0.0 }
0x1297   : > { %1780 = vadd.xlane.f32.xlu0 %v1779_v14 }
0x1320   : > { %v1776_v17 = vpop.xlane.xlu0 %1775 }
0x1321   : > { %v1777_v18 = vmul.f32 0.03125, %v1776_v17 }
0x1323   : > { %v1783_v20 = vmul.f32 %v1777_v18, %v1777_v18  ;;  %v1785_v24 = vsub.f32 %v1769_v10, %v1777_v18 }
0x1324   : > { %v1781_v19 = vpop.xlane.xlu0 %1780 }
0x1325   : > { %v1782_v21 = vmul.f32 0.03125, %v1781_v19 }
0x1327   : > { %v1784_v22 = vsub.f32 %v1782_v21, %v1783_v20 }
0x1329   : > { %v1786_v23 = vadd.f32 1e-05, %v1784_v22 }
0x132b   : > { %2461 = vrsqrt.f32 %v1786_v23 }
0x1335   : > { %v2462_v25 = vpop.eup %2461 }
0x1336   : > { %v1788_v27 = vmul.f32 %v2462_v25, %v1785_v24 }
0x1338   : > { %v1795_v28 = vmul.f32 %v2117_v26, %v1788_v27 }
0x133a   : > { %v1802_v29 = vadd.f32 %v2118_v1, %v1795_v28 }
0x133c   : > { %v1803_v30 = vsel %vm856_vm4, %v1802_v29, 0.0 }
0x133d   : > { %v1804_v31 = vrot.slane %v1803_v30, 4 }
0x133f   : > { %v1805_v32 = vadd.f32 %v1804_v31, %v1803_v30 }
0x1341   : > { %v1806_v33 = vrot.slane %v1805_v32, 2 }
0x1343   : > { %v1807_v34 = vadd.f32 %v1806_v33, %v1805_v32 }
0x1345   : > { %v1808_v35 = vrot.slane %v1807_v34, 1 }
0x1347   : > { %v1809_v36 = vadd.f32 %v1808_v35, %v1807_v34 }
0x1349   : > { %v1810_v37 = vpack.c.bf16 %v1809_v36, %v1809_v36 }
0x134b   : > { %2274 = vmatmul.mubr.msk.bf16.vlgmr.msra.gmra.mrb[28].mxu0 %vm856_vm4, %v1810_v37 }
0x141e   : > { %v1866_v40 = vpop.f32.mrb[28].mxu0 }
0x141f   : > { %v1867_v41 = vadd.f32 %v1866_v40, %v1816_v39  ;;  %v2275_v42 = vpop.f32.mrb[29].mxu0 }
0x1420   : > { %v1869_v43 = vpop.f32.mrb[30].mxu0 }
0x1421   : > { %1873 = vst.msk [vmem:[%s758_s20] sm:$0x1] %vm1872_vm7, %v1867_v41  ;;  %v2276_v44 = vpop.f32.mrb[31].mxu0 }
0x1422 PF: > { %p36_p7 = scmp.ge.s32.totalorder %s3221_s26, 4   ;;  %s3558_s20 = smov %s2819_s21 }
0x1423   : > { %s3559_s21 = smov %s2823_s1  ;;  %s3560_s1 = smov %s3233_s19 }
0x1424   : > { %s3561_s22 = smov %s3221_s26  ;;  %38 = sbr.rel (!%p36_p7) target bundleno = 22 (0x16), region = 188 }
0x142b   :  { %1891 = vsyncpa [#allocation4], 1 }
0x142c   :  { %1893 = vsyncpa [#allocation4 + $0x1], 1 }
0x142d   :  { %1894 = vsyncpa [#allocation6], 1 }
0x142e   :  { %1895 = vsyncpa [#allocation9], 1 }
0x142f   :  { %1896 = vsyncpa [#allocation12], 1 }
0x1430   :  { %1897 = vsyncpa [#allocation15], 1 }
0x1431   :  { %1898 = vsyncpa [#allocation18], 1 }

</bundles_post_ra>
